<compile_context>
chip_gen: v7x
topology: tpu7x:2x2x1
jax: 0.10.0
libtpu: 0.0.40
codegen_flags: <defaults>
</compile_context>

<pallas_src>
import functools
import math

import jax
import jax.numpy as jnp
from jax.experimental import pallas as pl
from jax.experimental.pallas import tpu as pltpu


# -----------------------------------------------------------------------------
# Model dimensions (lane-dense: feature widths are multiples of 128)
# -----------------------------------------------------------------------------
PATCH = 8
EMBED = 128          # feature width -> full 128-lane stores / MXU columns
MLP_HIDDEN = 256
VOCAB = 64


def _round_up(x, m):
    return ((x + m - 1) // m) * m


# -----------------------------------------------------------------------------
# Fused ViT token-path kernel:
#   patch-embed matmul -> +pos (b_patch folded in) -> MLP1(GELU) -> MLP2 ->
#   residual -> per-frame mean-pool over patches (hoisted bf16 pool matmul).
# One grid step processes a block of `tf` frames; weights are small and stay
# resident in VMEM.
# -----------------------------------------------------------------------------
def _vit_fused_kernel(patch_ref, pos_ref, pool_ref, wp_ref, w1_ref, b1_ref,
                      w2_ref, b2_ref, o_ref):
    x = patch_ref[...]                                      # bf16 [rows_blk, patch_dim_pad]
    tok = jnp.dot(x, wp_ref[...], preferred_element_type=jnp.float32)
    tok = tok + pos_ref[...]                                # pos tile already contains b_patch

    h = jnp.dot(tok.astype(jnp.bfloat16), w1_ref[...],
                preferred_element_type=jnp.float32) + b1_ref[...]
    h = jax.nn.gelu(h, approximate=True)                    # tanh approx -> EUP slot
    tok = tok + jnp.dot(h.astype(jnp.bfloat16), w2_ref[...],
                        preferred_element_type=jnp.float32) + b2_ref[...]

    # Per-frame mean pool over the n_patch patches: one bf16 MXU matmul with the
    # host-built pooling matrix (no in-kernel iota / integer divide / select).
    frame = jnp.dot(pool_ref[...], tok.astype(jnp.bfloat16),
                    preferred_element_type=jnp.float32)
    o_ref[...] = frame.astype(o_ref.dtype)                  # bf16 intermediate out


def _vit_vmem_bytes(tf, n_patch, patch_dim_pad):
    """Conservative per-step VMEM estimate (double-buffered blocks + intermediates)."""
    rows = tf * n_patch
    b = 0
    b += 2 * rows * patch_dim_pad * 2                       # patch slab block (bf16, x2 bufs)
    b += 2 * rows * EMBED * 4                               # pos tile (f32, counted x2)
    b += 2 * tf * rows * 2                                  # pool matrix (bf16)
    b += 2 * tf * EMBED * 2                                 # output block (bf16, x2 bufs)
    b += 2 * 2 * (patch_dim_pad * EMBED + 2 * EMBED * MLP_HIDDEN)    # weights (bf16)
    b += rows * (EMBED * 4 + MLP_HIDDEN * 4 + EMBED * 2 + MLP_HIDDEN * 2)  # tok/h + casts
    return b


def _pick_frame_tile(bf, n_patch, patch_dim_pad, budget_bytes=12 << 20, min_grid=2):
    """Largest legal frame block fitting the VMEM budget, preferring >=min_grid steps
    so the grid can be sharded across v7x's two TensorCores."""
    legal = [t for t in range(1, bf + 1)
             if bf % t == 0 and (t % 8 == 0 or t == bf)]
    fitting = [t for t in legal
               if _vit_vmem_bytes(t, n_patch, patch_dim_pad) <= budget_bytes]
    cands = fitting or [min(legal)]
    multi = [t for t in cands if bf // t >= min_grid]
    return max(multi) if multi else max(cands)


def vit_forward(patches_bf16, pos_tile, pool_patch, params, *, n_patch, tf,
                patch_dim_pad):
    rows_total = patches_bf16.shape[0]
    bf = rows_total // n_patch
    rows_blk = tf * n_patch
    vmem_est = _vit_vmem_bytes(tf, n_patch, patch_dim_pad)
    return pl.pallas_call(
        _vit_fused_kernel,
        out_shape=jax.ShapeDtypeStruct((bf, EMBED), jnp.bfloat16),
        grid=(bf // tf,),
        in_specs=[
            pl.BlockSpec((rows_blk, patch_dim_pad), lambda i: (i, 0)),   # patch slab block
            pl.BlockSpec((rows_blk, EMBED), lambda i: (0, 0)),           # pos tile (resident)
            pl.BlockSpec((tf, rows_blk), lambda i: (0, 0)),              # patch pool (resident)
            pl.BlockSpec((patch_dim_pad, EMBED), lambda i: (0, 0)),      # w_patch
            pl.BlockSpec((EMBED, MLP_HIDDEN), lambda i: (0, 0)),         # w_mlp1
            pl.BlockSpec((1, MLP_HIDDEN), lambda i: (0, 0)),             # b_mlp1
            pl.BlockSpec((MLP_HIDDEN, EMBED), lambda i: (0, 0)),         # w_mlp2
            pl.BlockSpec((1, EMBED), lambda i: (0, 0)),                  # b_mlp2
        ],
        out_specs=pl.BlockSpec((tf, EMBED), lambda i: (i, 0)),
        compiler_params=pltpu.CompilerParams(
            dimension_semantics=("parallel",),                           # megacore / dual-TC
            vmem_limit_bytes=int(min(48 << 20, max(16 << 20, 2 * vmem_est)))),
    )(patches_bf16, pos_tile, pool_patch, params["w_patch"],
      params["w_mlp1"], params["b_mlp1"], params["w_mlp2"], params["b_mlp2"])


# -----------------------------------------------------------------------------
# Branch-head kernels: (optional temporal pool) -> composed linear -> L2 norm.
# temporal_encoder∘video_adapter and gpt_proj∘text_adapter are pre-composed
# exactly on the host, so each branch is a single kernel.
# -----------------------------------------------------------------------------
def _pooled_head_kernel(pool_ref, x_ref, w_ref, b_ref, o_ref):
    pooled = jnp.dot(pool_ref[...], x_ref[...], preferred_element_type=jnp.float32)
    y = jnp.dot(pooled.astype(jnp.bfloat16), w_ref[...],
                preferred_element_type=jnp.float32) + b_ref[...]
    inv = jax.lax.rsqrt(jnp.sum(y * y, axis=-1, keepdims=True))    # EUP rsqrt
    o_ref[...] = (y * inv).astype(o_ref.dtype)


def _head_kernel(x_ref, w_ref, b_ref, o_ref):
    y = jnp.dot(x_ref[...], w_ref[...], preferred_element_type=jnp.float32) + b_ref[...]
    inv = jax.lax.rsqrt(jnp.sum(y * y, axis=-1, keepdims=True))
    o_ref[...] = (y * inv).astype(o_ref.dtype)


def _pick_row_tile(m, cap=256):
    for t in range(min(m, cap), 0, -1):
        if m % t == 0 and (t % 8 == 0 or t == m):
            return t
    return m


def video_head(pool_bf16, frame_emb_bf16, w, b):
    """Fused temporal mean over F (pool matmul) + composed linear + L2 normalize."""
    B, BF = pool_bf16.shape
    D = w.shape[1]
    tm = _pick_row_tile(B)
    return pl.pallas_call(
        _pooled_head_kernel,
        out_shape=jax.ShapeDtypeStruct((B, D), jnp.float32),
        grid=(B // tm,),
        in_specs=[
            pl.BlockSpec((tm, BF), lambda i: (i, 0)),
            pl.BlockSpec((BF, D), lambda i: (0, 0)),
            pl.BlockSpec((D, D), lambda i: (0, 0)),
            pl.BlockSpec((1, D), lambda i: (0, 0)),
        ],
        out_specs=pl.BlockSpec((tm, D), lambda i: (i, 0)),
        compiler_params=pltpu.CompilerParams(dimension_semantics=("parallel",)),
    )(pool_bf16, frame_emb_bf16, w, b)


def text_head(x_bf16, w, b):
    M, K = x_bf16.shape
    N = w.shape[1]
    tm = _pick_row_tile(M)
    return pl.pallas_call(
        _head_kernel,
        out_shape=jax.ShapeDtypeStruct((M, N), jnp.float32),
        grid=(M // tm,),
        in_specs=[
            pl.BlockSpec((tm, K), lambda i: (i, 0)),
            pl.BlockSpec((K, N), lambda i: (0, 0)),
            pl.BlockSpec((1, N), lambda i: (0, 0)),
        ],
        out_specs=pl.BlockSpec((tm, N), lambda i: (i, 0)),
        compiler_params=pltpu.CompilerParams(dimension_semantics=("parallel",)),
    )(x_bf16, w, b)


# -----------------------------------------------------------------------------
# Row-blocked logits + CrossEn loss kernel (train path):
#   sim_blk = (exp(scale) * V_blk) @ T^T     (scale applied to the (tv,D) operand)
#   v2t: softmax over text axis is complete per row block -> accumulate diag logp
#   t2v: online log-sum-exp over the video axis via per-column running
#        max / sum / diag accumulators in VMEM scratch.
# The full (Bv, Bt) similarity matrix never exists, so the kernel survives
# realistic post-all_gather batch sizes on v5e/v6e/v7x.
# -----------------------------------------------------------------------------
def _logits_loss_kernel(scale_ref, v_ref, t_ref, o_ref,
                        row_acc, col_max, col_sum, col_diag, *, count):
    i = pl.program_id(0)
    tv = v_ref.shape[0]
    bt = t_ref.shape[0]

    @pl.when(i == 0)
    def _():
        row_acc[...] = jnp.zeros_like(row_acc)
        col_max[...] = jnp.full_like(col_max, -jnp.inf)
        col_sum[...] = jnp.zeros_like(col_sum)
        col_diag[...] = jnp.zeros_like(col_diag)

    scale = jnp.exp(scale_ref[0])                           # logit_scale.exp()
    v = (v_ref[...] * scale).astype(jnp.bfloat16)           # scale (tv,D), not (tv,bt)
    t = t_ref[...].astype(jnp.bfloat16)
    sim = jax.lax.dot_general(v, t, (((1,), (1,)), ((), ())),
                              preferred_element_type=jnp.float32)   # (tv, bt)

    gr = i * tv + jax.lax.broadcasted_iota(jnp.int32, (tv, bt), 0)
    gc = jax.lax.broadcasted_iota(jnp.int32, (tv, bt), 1)
    diag_mask = (gc == gr) & (gr < count)

    # v2t direction (CrossEn(sim)): full text axis present in this block.
    row_max = jnp.max(sim, axis=1, keepdims=True)
    row_lse = jnp.log(jnp.sum(jnp.exp(sim - row_max), axis=1, keepdims=True)) + row_max
    diag_logp = jnp.sum(jnp.where(diag_mask, sim - row_lse, 0.0), axis=1, keepdims=True)
    row_acc[...] += jnp.sum(diag_logp, axis=0, keepdims=True)

    # t2v direction (CrossEn(sim.T)): online LSE over the row-blocked video axis.
    blk_max = jnp.max(sim, axis=0, keepdims=True)                    # (1, bt)
    m_new = jnp.maximum(col_max[...], blk_max)
    col_sum[...] = (col_sum[...] * jnp.exp(col_max[...] - m_new)
                    + jnp.sum(jnp.exp(sim - m_new), axis=0, keepdims=True))
    col_max[...] = m_new
    col_diag[...] += jnp.sum(jnp.where(diag_mask, sim, 0.0), axis=0, keepdims=True)

    @pl.when(i == pl.num_programs(0) - 1)
    def _():
        col_idx = jax.lax.broadcasted_iota(jnp.int32, (1, bt), 1)
        logp_col = col_diag[...] - (col_max[...] + jnp.log(col_sum[...]))
        t2v = -jnp.sum(jnp.where(col_idx < count, logp_col, 0.0),
                       axis=1, keepdims=True) / count
        v2t = -row_acc[...] / count
        o_ref[...] = 0.5 * (v2t + t2v)


def clip_contrastive_loss(video_features, text_features, logit_scale):
    Bv, D = video_features.shape
    Bt, _ = text_features.shape
    count = min(Bv, Bt)                                      # torch.diag length
    tv = _pick_row_tile(Bv)
    # clamp_logit_scale(100) applied every forward (no-op for the in-range init).
    scale = jnp.clip(jnp.asarray(logit_scale, jnp.float32),
                     -math.log(100.0), math.log(100.0)).reshape(1)
    out = pl.pallas_call(
        functools.partial(_logits_loss_kernel, count=count),
        out_shape=jax.ShapeDtypeStruct((1, 1), jnp.float32),
        grid=(Bv // tv,),
        in_specs=[
            pl.BlockSpec(memory_space=pltpu.SMEM),                     # scale (scalar)
            pl.BlockSpec((tv, D), lambda i: (i, 0)),                   # V row block
            pl.BlockSpec((Bt, D), lambda i: (0, 0)),                   # T resident
        ],
        out_specs=pl.BlockSpec((1, 1), lambda i: (0, 0)),
        scratch_shapes=[
            pltpu.VMEM((1, 1), jnp.float32),                           # row_acc
            pltpu.VMEM((1, Bt), jnp.float32),                          # col_max
            pltpu.VMEM((1, Bt), jnp.float32),                          # col_sum
            pltpu.VMEM((1, Bt), jnp.float32),                          # col_diag
        ],
        compiler_params=pltpu.CompilerParams(dimension_semantics=("arbitrary",)),
    )(scale, video_features, text_features)
    return out[0, 0]


# -----------------------------------------------------------------------------
# Parameters (synthesized sub-modules, deterministic init, bf16 matmul weights)
# -----------------------------------------------------------------------------
def init_params(key, channels=3, image_size=32, frame_num=4):
    n_patch = (image_size // PATCH) ** 2
    patch_dim = channels * PATCH * PATCH
    patch_dim_pad = _round_up(patch_dim, 128)
    ks = jax.random.split(key, 10)
    std = 0.02

    def w(k, shape):
        return std * jax.random.normal(k, shape, dtype=jnp.float32)

    # raw synthesized sub-module weights (f32)
    w_patch = w(ks[0], (patch_dim, EMBED))
    w_patch_pad = jnp.zeros((patch_dim_pad, EMBED), jnp.float32).at[:patch_dim].set(w_patch)
    pos_emb = w(ks[1], (n_patch, EMBED))
    w_mlp1 = w(ks[2], (EMBED, MLP_HIDDEN))
    w_mlp2 = w(ks[3], (MLP_HIDDEN, EMBED))
    w_temp = w(ks[4], (EMBED, EMBED))
    b_temp = jnp.zeros((EMBED,), jnp.float32)
    w_vadapt = w(ks[5], (EMBED, EMBED))
    b_vadapt = jnp.zeros((EMBED,), jnp.float32)
    token_emb = w(ks[6], (VOCAB, EMBED))
    w_gpt = w(ks[7], (EMBED, EMBED))
    b_gpt = jnp.zeros((EMBED,), jnp.float32)
    w_tadapt = w(ks[8], (EMBED, EMBED))
    b_tadapt = jnp.zeros((EMBED,), jnp.float32)

    # Exact pre-composition of back-to-back linears (no nonlinearity between):
    #   video: temporal_encoder ∘ video_adapter ; text: gpt_proj ∘ text_adapter
    w_vhead = w_temp @ w_vadapt
    b_vhead = b_temp @ w_vadapt + b_vadapt
    w_thead = w_gpt @ w_tadapt
    b_thead = b_gpt @ w_tadapt + b_tadapt

    return {
        # ViT (fused kernel weights; bf16 matmul operands, f32 biases / pos-emb)
        "w_patch": w_patch_pad.astype(jnp.bfloat16),      # zero-padded K rows (192 -> 256)
        "b_patch": jnp.zeros((1, EMBED), jnp.float32),    # folded into pos tile in forward
        "pos_emb": pos_emb,
        "w_mlp1": w_mlp1.astype(jnp.bfloat16),
        "b_mlp1": jnp.zeros((1, MLP_HIDDEN), jnp.float32),
        "w_mlp2": w_mlp2.astype(jnp.bfloat16),
        "b_mlp2": jnp.zeros((1, EMBED), jnp.float32),
        # composed branch heads
        "w_vhead": w_vhead.astype(jnp.bfloat16),
        "b_vhead": b_vhead.reshape(1, EMBED),
        "token_emb": token_emb,
        "w_thead": w_thead.astype(jnp.bfloat16),
        "b_thead": b_thead.reshape(1, EMBED),
        # logit scale (CLIP init); clamp re-applied every forward in the loss path
        "logit_scale": jnp.asarray(math.log(1.0 / 0.07), jnp.float32),
        "frame_num": frame_num,
    }


# -----------------------------------------------------------------------------
# Forward (glue in plain JAX, all hot compute in the fused Pallas kernels)
# -----------------------------------------------------------------------------
def naive_clip_forward(params, video, text, train=False, all_gather=True):
    B, F, C, H, W = video.shape
    p = PATCH
    gh, gw = H // p, W // p
    n_patch = gh * gw
    bf = B * F
    patch_dim = C * p * p
    patch_dim_pad = _round_up(patch_dim, 128)

    # ---------------- get_image_embedding (ViT, ONE fused pallas_call) ------
    # Cast to bf16 BEFORE the patchify transpose so the XLA transpose moves half
    # the bytes; zero-pad the patch feature dim to a full lane multiple.
    # TODO(synk): accept channels-last video (or DMA-gather patch rows in-kernel
    # with memory_space=pl.ANY) to remove this HBM transpose entirely.
    frames = video.astype(jnp.bfloat16).reshape(bf, C, gh, p, gw, p)
    patches = frames.transpose(0, 2, 4, 1, 3, 5).reshape(bf * n_patch, patch_dim)
    patches = jnp.pad(patches, ((0, 0), (0, patch_dim_pad - patch_dim)))

    tf = _pick_frame_tile(bf, n_patch, patch_dim_pad)
    # One frame-block worth of pos-emb (constant index_map -> reused every step,
    # counted in the VMEM budget); the all-zero b_patch is folded in on the host.
    pos_tile = jnp.tile(params["pos_emb"], (tf, 1)) + params["b_patch"]
    # Hoisted bf16 patch-pooling matrix (1/n_patch exact in bf16 for pow2 n_patch).
    pool_patch = jnp.kron(jnp.eye(tf, dtype=jnp.float32),
                          jnp.full((1, n_patch), 1.0 / n_patch, jnp.float32)
                          ).astype(jnp.bfloat16)

    frame_embedding = vit_forward(patches, pos_tile, pool_patch, params,
                                  n_patch=n_patch, tf=tf,
                                  patch_dim_pad=patch_dim_pad)     # [B*F, D] bf16

    # ---------------- get_video_embedding -----------------------------------
    # Temporal mean over F fused into the head kernel as a bf16 pool matmul.
    pool_t = jnp.kron(jnp.eye(B, dtype=jnp.float32),
                      jnp.full((1, F), 1.0 / F, jnp.float32)).astype(jnp.bfloat16)
    clips_features = video_head(pool_t, frame_embedding,
                                params["w_vhead"], params["b_vhead"])

    # ---------------- get_text_embedding -------------------------------------
    # TODO(synk): real GPT omitted — synthesized as token-embedding mean (glue).
    txt = jnp.take(params["token_emb"], text, axis=0).mean(axis=1).astype(jnp.bfloat16)
    text_features = text_head(txt, params["w_thead"], params["b_thead"])

    # all_gather: single-device identity here.
    # TODO(synk): cross-device AllGather (jax.lax.all_gather under shard_map) omitted.

    if train:
        # Row-blocked logits + both-direction CrossEn in one kernel.
        return clip_contrastive_loss(clips_features, text_features,
                                     params["logit_scale"])
    return clips_features, text_features


# -----------------------------------------------------------------------------
# Driver
# -----------------------------------------------------------------------------
if __name__ == "__main__":
    key = jax.random.PRNGKey(0)
    k_param, k_video, k_text = jax.random.split(key, 3)

    B, F, C, H, W = 4, 4, 3, 32, 32      # bf=16 -> 2-step "parallel" ViT grid
    Bt, L = 4, 8

    params = init_params(k_param, channels=C, image_size=H, frame_num=F)
    video = jax.random.normal(k_video, (B, F, C, H, W), dtype=jnp.float32)
    text = jax.random.randint(k_text, (Bt, L), 0, VOCAB, dtype=jnp.int32)

    eval_fn = jax.jit(lambda prm, v, t: naive_clip_forward(prm, v, t, train=False))
    train_fn = jax.jit(lambda prm, v, t: naive_clip_forward(prm, v, t, train=True))

    # eval path: returns (clips_features, text_features)
    clips_features, text_features = eval_fn(params, video, text)
    # train path: contrastive CrossEn loss from the row-blocked logits+loss kernel
    loss = train_fn(params, video, text)

    jax.block_until_ready((clips_features, text_features, loss))

    assert clips_features.shape == (B, EMBED)
    assert text_features.shape == (Bt, EMBED)
    assert bool(jnp.isfinite(loss))
    print("KERNEL_OK")
</pallas_src>

<mosaic_0001>
module attributes {stable_mosaic.version = 11 : i64} {
  func.func @_vit_fused_kernel(%arg0: i32, %arg1: memref<128x256xbf16, #tpu.memory_space<vmem>>, %arg2: memref<128x128xf32, #tpu.memory_space<vmem>>, %arg3: memref<8x128xbf16, #tpu.memory_space<vmem>>, %arg4: memref<256x128xbf16, #tpu.memory_space<vmem>>, %arg5: memref<128x256xbf16, #tpu.memory_space<vmem>>, %arg6: memref<1x256xf32, #tpu.memory_space<vmem>>, %arg7: memref<256x128xbf16, #tpu.memory_space<vmem>>, %arg8: memref<1x128xf32, #tpu.memory_space<vmem>>, %arg9: memref<8x128xbf16, #tpu.memory_space<vmem>>) attributes {dimension_semantics = [#tpu.dimension_semantics<parallel>], iteration_bounds = array<i64: 2>, scalar_prefetch = 0 : i64, scratch_operands = 0 : i64, tpu.core_type = #tpu.core_type<tc>, window_params = [{transform_indices = @transform_0, window_bounds = array<i64: 128, 256>}, {pipeline_mode = #tpu.pipeline_mode<synchronous>, transform_indices = @transform_1, window_bounds = array<i64: 128, 128>}, {pipeline_mode = #tpu.pipeline_mode<synchronous>, transform_indices = @transform_2, window_bounds = array<i64: 8, 128>}, {pipeline_mode = #tpu.pipeline_mode<synchronous>, transform_indices = @transform_3, window_bounds = array<i64: 256, 128>}, {pipeline_mode = #tpu.pipeline_mode<synchronous>, transform_indices = @transform_4, window_bounds = array<i64: 128, 256>}, {pipeline_mode = #tpu.pipeline_mode<synchronous>, transform_indices = @transform_5, window_bounds = array<i64: 1, 256>}, {pipeline_mode = #tpu.pipeline_mode<synchronous>, transform_indices = @transform_6, window_bounds = array<i64: 256, 128>}, {pipeline_mode = #tpu.pipeline_mode<synchronous>, transform_indices = @transform_7, window_bounds = array<i64: 1, 128>}, {transform_indices = @transform_8, window_bounds = array<i64: 8, 128>}]} {
    %c0 = arith.constant 0 : index
    %c0_0 = arith.constant 0 : index
    %0 = vector.load %arg1[%c0, %c0_0] : memref<128x256xbf16, #tpu.memory_space<vmem>>, vector<128x256xbf16>
    %c0_1 = arith.constant 0 : index
    %c0_2 = arith.constant 0 : index
    %1 = vector.load %arg4[%c0_1, %c0_2] : memref<256x128xbf16, #tpu.memory_space<vmem>>, vector<256x128xbf16>
    %cst = arith.constant dense<0.000000e+00> : vector<128x128xf32>
    %2 = tpu.matmul %0, %1, %cst {dimension_numbers = #tpu.dot_dimension_numbers<[1], [0], [0], [1], [0, 0, 1, 1], [], []>} : vector<128x256xbf16>, vector<256x128xbf16>, vector<128x128xf32> -> vector<128x128xf32>
    %c0_3 = arith.constant 0 : index
    %c0_4 = arith.constant 0 : index
    %3 = vector.load %arg2[%c0_3, %c0_4] : memref<128x128xf32, #tpu.memory_space<vmem>>, vector<128x128xf32>
    %4 = arith.addf %2, %3 : vector<128x128xf32>
    %5 = arith.truncf %4 : vector<128x128xf32> to vector<128x128xbf16>
    %c0_5 = arith.constant 0 : index
    %c0_6 = arith.constant 0 : index
    %6 = vector.load %arg5[%c0_5, %c0_6] : memref<128x256xbf16, #tpu.memory_space<vmem>>, vector<128x256xbf16>
    %cst_7 = arith.constant dense<0.000000e+00> : vector<128x256xf32>
    %7 = tpu.matmul %5, %6, %cst_7 {dimension_numbers = #tpu.dot_dimension_numbers<[1], [0], [0], [1], [0, 0, 1, 1], [], []>} : vector<128x128xbf16>, vector<128x256xbf16>, vector<128x256xf32> -> vector<128x256xf32>
    %c0_8 = arith.constant 0 : index
    %c0_9 = arith.constant 0 : index
    %8 = vector.load %arg6[%c0_8, %c0_9] : memref<1x256xf32, #tpu.memory_space<vmem>>, vector<1x256xf32>
    %9 = vector.broadcast %8 : vector<1x256xf32> to vector<128x256xf32>
    %10 = arith.addf %7, %9 : vector<128x256xf32>
    %11 = arith.mulf %10, %10 : vector<128x256xf32>
    %12 = arith.mulf %10, %11 : vector<128x256xf32>
    %cst_10 = arith.constant 4.471500e-02 : f32
    %13 = vector.broadcast %cst_10 : f32 to vector<128x256xf32>
    %14 = arith.mulf %13, %12 : vector<128x256xf32>
    %15 = arith.addf %10, %14 : vector<128x256xf32>
    %cst_11 = arith.constant 0.797884583 : f32
    %16 = vector.broadcast %cst_11 : f32 to vector<128x256xf32>
    %17 = arith.mulf %16, %15 : vector<128x256xf32>
    %18 = math.tanh %17 : vector<128x256xf32>
    %cst_12 = arith.constant 1.000000e+00 : f32
    %19 = vector.broadcast %cst_12 : f32 to vector<128x256xf32>
    %20 = arith.addf %19, %18 : vector<128x256xf32>
    %cst_13 = arith.constant 5.000000e-01 : f32
    %21 = vector.broadcast %cst_13 : f32 to vector<128x256xf32>
    %22 = arith.mulf %21, %20 : vector<128x256xf32>
    %23 = arith.mulf %10, %22 : vector<128x256xf32>
    %24 = arith.truncf %23 : vector<128x256xf32> to vector<128x256xbf16>
    %c0_14 = arith.constant 0 : index
    %c0_15 = arith.constant 0 : index
    %25 = vector.load %arg7[%c0_14, %c0_15] : memref<256x128xbf16, #tpu.memory_space<vmem>>, vector<256x128xbf16>
    %cst_16 = arith.constant dense<0.000000e+00> : vector<128x128xf32>
    %26 = tpu.matmul %24, %25, %cst_16 {dimension_numbers = #tpu.dot_dimension_numbers<[1], [0], [0], [1], [0, 0, 1, 1], [], []>} : vector<128x256xbf16>, vector<256x128xbf16>, vector<128x128xf32> -> vector<128x128xf32>
    %27 = arith.addf %4, %26 : vector<128x128xf32>
    %c0_17 = arith.constant 0 : index
    %c0_18 = arith.constant 0 : index
    %28 = vector.load %arg8[%c0_17, %c0_18] : memref<1x128xf32, #tpu.memory_space<vmem>>, vector<1x128xf32>
    %29 = vector.broadcast %28 : vector<1x128xf32> to vector<128x128xf32>
    %30 = arith.addf %27, %29 : vector<128x128xf32>
    %c0_19 = arith.constant 0 : index
    %c0_20 = arith.constant 0 : index
    %31 = vector.load %arg3[%c0_19, %c0_20] : memref<8x128xbf16, #tpu.memory_space<vmem>>, vector<8x128xbf16>
    %32 = arith.truncf %30 : vector<128x128xf32> to vector<128x128xbf16>
    %cst_21 = arith.constant dense<0.000000e+00> : vector<8x128xf32>
    %33 = tpu.matmul %31, %32, %cst_21 {dimension_numbers = #tpu.dot_dimension_numbers<[1], [0], [0], [1], [0, 0, 1, 1], [], []>} : vector<8x128xbf16>, vector<128x128xbf16>, vector<8x128xf32> -> vector<8x128xf32>
    %34 = arith.truncf %33 : vector<8x128xf32> to vector<8x128xbf16>
    %c0_22 = arith.constant 0 : index
    %c0_23 = arith.constant 0 : index
    %35 = vector.load %arg9[%c0_22, %c0_23] : memref<8x128xbf16, #tpu.memory_space<vmem>>, vector<8x128xbf16>
    tpu.vector_store %arg9[%c0_22, %c0_23], %34 {strides = array<i32>} : memref<8x128xbf16, #tpu.memory_space<vmem>>, vector<8x128xbf16>,
    return
  }
  func.func @transform_0(%arg0: i32) -> (i32, i32) {
    %c0_i32 = arith.constant 0 : i32
    %c0_i32_0 = arith.constant 0 : i32
    return %arg0, %c0_i32 : i32, i32
  }
  func.func @transform_1(%arg0: i32) -> (i32, i32) {
    %c0_i32 = arith.constant 0 : i32
    %c0_i32_0 = arith.constant 0 : i32
    %c0_i32_1 = arith.constant 0 : i32
    return %c0_i32, %c0_i32_0 : i32, i32
  }
  func.func @transform_2(%arg0: i32) -> (i32, i32) {
    %c0_i32 = arith.constant 0 : i32
    %c0_i32_0 = arith.constant 0 : i32
    %c0_i32_1 = arith.constant 0 : i32
    return %c0_i32, %c0_i32_0 : i32, i32
  }
  func.func @transform_3(%arg0: i32) -> (i32, i32) {
    %c0_i32 = arith.constant 0 : i32
    %c0_i32_0 = arith.constant 0 : i32
    %c0_i32_1 = arith.constant 0 : i32
    return %c0_i32, %c0_i32_0 : i32, i32
  }
  func.func @transform_4(%arg0: i32) -> (i32, i32) {
    %c0_i32 = arith.constant 0 : i32
    %c0_i32_0 = arith.constant 0 : i32
    %c0_i32_1 = arith.constant 0 : i32
    return %c0_i32, %c0_i32_0 : i32, i32
  }
  func.func @transform_5(%arg0: i32) -> (i32, i32) {
    %c0_i32 = arith.constant 0 : i32
    %c0_i32_0 = arith.constant 0 : i32
    %c0_i32_1 = arith.constant 0 : i32
    return %c0_i32, %c0_i32_0 : i32, i32
  }
  func.func @transform_6(%arg0: i32) -> (i32, i32) {
    %c0_i32 = arith.constant 0 : i32
    %c0_i32_0 = arith.constant 0 : i32
    %c0_i32_1 = arith.constant 0 : i32
    return %c0_i32, %c0_i32_0 : i32, i32
  }
  func.func @transform_7(%arg0: i32) -> (i32, i32) {
    %c0_i32 = arith.constant 0 : i32
    %c0_i32_0 = arith.constant 0 : i32
    %c0_i32_1 = arith.constant 0 : i32
    return %c0_i32, %c0_i32_0 : i32, i32
  }
  func.func @transform_8(%arg0: i32) -> (i32, i32) {
    %c0_i32 = arith.constant 0 : i32
    %c0_i32_0 = arith.constant 0 : i32
    return %arg0, %c0_i32 : i32, i32
  }
}

module attributes {stable_mosaic.version = 11 : i64} {
  func.func @_pooled_head_kernel(%arg0: i32, %arg1: memref<4x16xbf16, #tpu.memory_space<vmem>>, %arg2: memref<16x128xbf16, #tpu.memory_space<vmem>>, %arg3: memref<128x128xbf16, #tpu.memory_space<vmem>>, %arg4: memref<1x128xf32, #tpu.memory_space<vmem>>, %arg5: memref<4x128xf32, #tpu.memory_space<vmem>>) attributes {dimension_semantics = [#tpu.dimension_semantics<parallel>], iteration_bounds = array<i64: 1>, scalar_prefetch = 0 : i64, scratch_operands = 0 : i64, tpu.core_type = #tpu.core_type<tc>, window_params = [{transform_indices = @transform_0, window_bounds = array<i64: 4, 16>}, {pipeline_mode = #tpu.pipeline_mode<synchronous>, transform_indices = @transform_1, window_bounds = array<i64: 16, 128>}, {pipeline_mode = #tpu.pipeline_mode<synchronous>, transform_indices = @transform_2, window_bounds = array<i64: 128, 128>}, {pipeline_mode = #tpu.pipeline_mode<synchronous>, transform_indices = @transform_3, window_bounds = array<i64: 1, 128>}, {transform_indices = @transform_4, window_bounds = array<i64: 4, 128>}]} {
    %c0 = arith.constant 0 : index
    %c0_0 = arith.constant 0 : index
    %0 = vector.load %arg1[%c0, %c0_0] : memref<4x16xbf16, #tpu.memory_space<vmem>>, vector<4x16xbf16>
    %c0_1 = arith.constant 0 : index
    %c0_2 = arith.constant 0 : index
    %1 = vector.load %arg2[%c0_1, %c0_2] : memref<16x128xbf16, #tpu.memory_space<vmem>>, vector<16x128xbf16>
    %cst = arith.constant dense<0.000000e+00> : vector<4x128xf32>
    %2 = tpu.matmul %0, %1, %cst {dimension_numbers = #tpu.dot_dimension_numbers<[1], [0], [0], [1], [0, 0, 1, 1], [], []>} : vector<4x16xbf16>, vector<16x128xbf16>, vector<4x128xf32> -> vector<4x128xf32>
    %3 = arith.truncf %2 : vector<4x128xf32> to vector<4x128xbf16>
    %c0_3 = arith.constant 0 : index
    %c0_4 = arith.constant 0 : index
    %4 = vector.load %arg3[%c0_3, %c0_4] : memref<128x128xbf16, #tpu.memory_space<vmem>>, vector<128x128xbf16>
    %cst_5 = arith.constant dense<0.000000e+00> : vector<4x128xf32>
    %5 = tpu.matmul %3, %4, %cst_5 {dimension_numbers = #tpu.dot_dimension_numbers<[1], [0], [0], [1], [0, 0, 1, 1], [], []>} : vector<4x128xbf16>, vector<128x128xbf16>, vector<4x128xf32> -> vector<4x128xf32>
    %c0_6 = arith.constant 0 : index
    %c0_7 = arith.constant 0 : index
    %6 = vector.load %arg4[%c0_6, %c0_7] : memref<1x128xf32, #tpu.memory_space<vmem>>, vector<1x128xf32>
    %7 = vector.broadcast %6 : vector<1x128xf32> to vector<4x128xf32>
    %8 = arith.addf %5, %7 : vector<4x128xf32>
    %9 = arith.mulf %8, %8 : vector<4x128xf32>
    %cst_8 = arith.constant dense<0.000000e+00> : vector<4xf32>
    %10 = vector.multi_reduction <add>, %9, %cst_8 [1] : vector<4x128xf32> to vector<4xf32>
    %11 = vector.shape_cast %10 : vector<4xf32> to vector<4x1xf32>
    %12 = math.rsqrt %11 : vector<4x1xf32>
    %13 = vector.broadcast %12 : vector<4x1xf32> to vector<4x128xf32>
    %14 = arith.mulf %8, %13 : vector<4x128xf32>
    %c0_9 = arith.constant 0 : index
    %c0_10 = arith.constant 0 : index
    %15 = vector.load %arg5[%c0_9, %c0_10] : memref<4x128xf32, #tpu.memory_space<vmem>>, vector<4x128xf32>
    tpu.vector_store %arg5[%c0_9, %c0_10], %14 {strides = array<i32>} : memref<4x128xf32, #tpu.memory_space<vmem>>, vector<4x128xf32>,
    return
  }
  func.func @transform_0(%arg0: i32) -> (i32, i32) {
    %c0_i32 = arith.constant 0 : i32
    %c0_i32_0 = arith.constant 0 : i32
    return %arg0, %c0_i32 : i32, i32
  }
  func.func @transform_1(%arg0: i32) -> (i32, i32) {
    %c0_i32 = arith.constant 0 : i32
    %c0_i32_0 = arith.constant 0 : i32
    %c0_i32_1 = arith.constant 0 : i32
    return %c0_i32, %c0_i32_0 : i32, i32
  }
  func.func @transform_2(%arg0: i32) -> (i32, i32) {
    %c0_i32 = arith.constant 0 : i32
    %c0_i32_0 = arith.constant 0 : i32
    %c0_i32_1 = arith.constant 0 : i32
    return %c0_i32, %c0_i32_0 : i32, i32
  }
  func.func @transform_3(%arg0: i32) -> (i32, i32) {
    %c0_i32 = arith.constant 0 : i32
    %c0_i32_0 = arith.constant 0 : i32
    %c0_i32_1 = arith.constant 0 : i32
    return %c0_i32, %c0_i32_0 : i32, i32
  }
  func.func @transform_4(%arg0: i32) -> (i32, i32) {
    %c0_i32 = arith.constant 0 : i32
    %c0_i32_0 = arith.constant 0 : i32
    return %arg0, %c0_i32 : i32, i32
  }
}

module attributes {stable_mosaic.version = 11 : i64} {
  func.func @_head_kernel(%arg0: i32, %arg1: memref<4x128xbf16, #tpu.memory_space<vmem>>, %arg2: memref<128x128xbf16, #tpu.memory_space<vmem>>, %arg3: memref<1x128xf32, #tpu.memory_space<vmem>>, %arg4: memref<4x128xf32, #tpu.memory_space<vmem>>) attributes {dimension_semantics = [#tpu.dimension_semantics<parallel>], iteration_bounds = array<i64: 1>, scalar_prefetch = 0 : i64, scratch_operands = 0 : i64, tpu.core_type = #tpu.core_type<tc>, window_params = [{transform_indices = @transform_0, window_bounds = array<i64: 4, 128>}, {pipeline_mode = #tpu.pipeline_mode<synchronous>, transform_indices = @transform_1, window_bounds = array<i64: 128, 128>}, {pipeline_mode = #tpu.pipeline_mode<synchronous>, transform_indices = @transform_2, window_bounds = array<i64: 1, 128>}, {transform_indices = @transform_3, window_bounds = array<i64: 4, 128>}]} {
    %c0 = arith.constant 0 : index
    %c0_0 = arith.constant 0 : index
    %0 = vector.load %arg1[%c0, %c0_0] : memref<4x128xbf16, #tpu.memory_space<vmem>>, vector<4x128xbf16>
    %c0_1 = arith.constant 0 : index
    %c0_2 = arith.constant 0 : index
    %1 = vector.load %arg2[%c0_1, %c0_2] : memref<128x128xbf16, #tpu.memory_space<vmem>>, vector<128x128xbf16>
    %cst = arith.constant dense<0.000000e+00> : vector<4x128xf32>
    %2 = tpu.matmul %0, %1, %cst {dimension_numbers = #tpu.dot_dimension_numbers<[1], [0], [0], [1], [0, 0, 1, 1], [], []>} : vector<4x128xbf16>, vector<128x128xbf16>, vector<4x128xf32> -> vector<4x128xf32>
    %c0_3 = arith.constant 0 : index
    %c0_4 = arith.constant 0 : index
    %3 = vector.load %arg3[%c0_3, %c0_4] : memref<1x128xf32, #tpu.memory_space<vmem>>, vector<1x128xf32>
    %4 = vector.broadcast %3 : vector<1x128xf32> to vector<4x128xf32>
    %5 = arith.addf %2, %4 : vector<4x128xf32>
    %6 = arith.mulf %5, %5 : vector<4x128xf32>
    %cst_5 = arith.constant dense<0.000000e+00> : vector<4xf32>
    %7 = vector.multi_reduction <add>, %6, %cst_5 [1] : vector<4x128xf32> to vector<4xf32>
    %8 = vector.shape_cast %7 : vector<4xf32> to vector<4x1xf32>
    %9 = math.rsqrt %8 : vector<4x1xf32>
    %10 = vector.broadcast %9 : vector<4x1xf32> to vector<4x128xf32>
    %11 = arith.mulf %5, %10 : vector<4x128xf32>
    %c0_6 = arith.constant 0 : index
    %c0_7 = arith.constant 0 : index
    %12 = vector.load %arg4[%c0_6, %c0_7] : memref<4x128xf32, #tpu.memory_space<vmem>>, vector<4x128xf32>
    tpu.vector_store %arg4[%c0_6, %c0_7], %11 {strides = array<i32>} : memref<4x128xf32, #tpu.memory_space<vmem>>, vector<4x128xf32>,
    return
  }
  func.func @transform_0(%arg0: i32) -> (i32, i32) {
    %c0_i32 = arith.constant 0 : i32
    %c0_i32_0 = arith.constant 0 : i32
    return %arg0, %c0_i32 : i32, i32
  }
  func.func @transform_1(%arg0: i32) -> (i32, i32) {
    %c0_i32 = arith.constant 0 : i32
    %c0_i32_0 = arith.constant 0 : i32
    %c0_i32_1 = arith.constant 0 : i32
    return %c0_i32, %c0_i32_0 : i32, i32
  }
  func.func @transform_2(%arg0: i32) -> (i32, i32) {
    %c0_i32 = arith.constant 0 : i32
    %c0_i32_0 = arith.constant 0 : i32
    %c0_i32_1 = arith.constant 0 : i32
    return %c0_i32, %c0_i32_0 : i32, i32
  }
  func.func @transform_3(%arg0: i32) -> (i32, i32) {
    %c0_i32 = arith.constant 0 : i32
    %c0_i32_0 = arith.constant 0 : i32
    return %arg0, %c0_i32 : i32, i32
  }
}

</mosaic_0001>

<bundles_post_ra>
// kernel: _lambda_.3
= control target key start
LH: loop header
LB: loop body
LE: loop exit
PB: predicated region body
PF: predicated region fallthrough
CT: control target
= control target key end

     0   :  { %s2009_s27 = smov 0   ;;  %s2681_s0 = inlined_call_operand.vmem [shape: bf16[256,256], index: 0, kind: input, shape index: {}]   ;;  %s2682_s1 = inlined_call_operand.vmem [shape: f32[128,128], index: 1, kind: input, shape index: {}]   ;;  %s2683_s2 = inlined_call_operand.vmem [shape: bf16[8,128], index: 2, kind: input, shape index: {}]   ;;  %s2684_s3 = inlined_call_operand.vmem [shape: bf16[256,128], index: 3, kind: input, shape index: {}]   ;;  %s2685_s4 = inlined_call_operand.vmem [shape: bf16[128,256], index: 4, kind: input, shape index: {}]   ;;  %s2686_s5 = inlined_call_operand.vmem [shape: f32[1,256], index: 5, kind: input, shape index: {}]   ;;  %s2687_s6 = inlined_call_operand.vmem [shape: bf16[256,128], index: 6, kind: input, shape index: {}]   ;;  %s2688_s7 = inlined_call_operand.vmem [shape: f32[1,128], index: 7, kind: input, shape index: {}]   ;;  %s2689_s8 = inlined_call_operand.vmem [shape: bf16[16,128], index: 8, kind: output, shape index: {}]  }
   0x1 LB: > { %s2015_s28 = sadd.s32 4294967295, %s1959_s27   ;;  %p1552_p0 = scmp.ge.s32.totalorder %s1959_s27, 1  ;;  %s1959_s27 = sphi %s2009_s27, %s18_s27  }
   0x2   : > { %p264_p1 = scmp.lt.s32.totalorder %s1959_s27, 3 }
   0x4   : > { %p265_p2 = pnand %p1552_p0, %p264_p1 }
   0x6   : > { %268 = sbr.rel (%p265_p2) target bundleno = 1031 (0x407), region = 52 }
   0xd   : > { %v1809_v0 = vld [vmem:[%s2684_s3 + $0x40] sm:$0xff]   ;;  %s1553_s9 = sshll.u32 %s2015_s28, 4  ;;  %v1811_v2 = vld [vmem:[%s2684_s3 + $0x48] sm:$0xff]   ;;  %v1813_v4 = vld [vmem:[%s2684_s3 + $0x50] sm:$0xff]   ;;  %v1961_v48 = vmov 0   ;;  %vm1963_vm0 = vmmov 0  }
   0xe   : > { %v1810_v1 = vld [vmem:[%s2684_s3] sm:$0xff]   ;;  %1625 = vmatprep.subr.bf16.mxu0 %v1809_v0  ;;  %1782 = vmatprep.subr.bf16.mxu1 %v1809_v0  ;;  %v1812_v3 = vld [vmem:[%s2684_s3 + $0x8] sm:$0xff]   ;;  %p299_p3 = scmp.lt.s32.totalorder %s1553_s9, 31  ;;  %v1814_v5 = vld [vmem:[%s2684_s3 + $0x10] sm:$0xff]   ;;  %p305_p4 = scmp.lt.s32.totalorder %s2015_s28, 1 }
   0xf   : > { %1626 = vmatpush3.bf16.msra.mxu0 %v1810_v1  ;;  %1790 = vmatpush3.bf16.msra.mxu1 %v1810_v1  ;;  %v1815_v6 = vld [vmem:[%s2684_s3 + $0x58] sm:$0xff]   ;;  %v1817_v8 = vld [vmem:[%s2684_s3 + $0x60] sm:$0xff]   ;;  %v1819_v10 = vld [vmem:[%s2684_s3 + $0x68] sm:$0xff]  }
  0x10   : > { %1627 = vmatprep.subr.bf16.mxu0 %v1811_v2  ;;  %1783 = vmatprep.subr.bf16.mxu1 %v1811_v2  ;;  %s2713_s9 = smov (!%p299_p3, %s1553_s9), 31  ;;  %v1816_v7 = vld [vmem:[%s2684_s3 + $0x18] sm:$0xff]   ;;  %v1818_v9 = vld [vmem:[%s2684_s3 + $0x20] sm:$0xff]   ;;  %v1820_v12 = vld [vmem:[%s2684_s3 + $0x28] sm:$0xff]   ;;  %s2715_s28 = smov (!%p305_p4, %s2015_s28), 1 }
  0x11   : > { %s1624_s24 = sshll.u32 %s2713_s9, 3  ;;  %v1821_v13 = vld [vmem:[%s2684_s3 + $0x70] sm:$0xff]   ;;  %v1823_v16 = vld [vmem:[%s2684_s3 + $0x78] sm:$0xff]   ;;  %v1851_v18 = vld [vmem:[%s2685_s4 + $0x4] ss:$8 sps:$4 sm:$0xff]   ;;  %s1556_s29 = sshll.u32 %s2715_s28, 2 }
  0x12   : > { %s2050_s10 = scalar_lea.vmem %s2681_s0, %s1624_s24  ;;  %v1822_v15 = vld [vmem:[%s2684_s3 + $0x30] sm:$0xff]   ;;  %v1824_v17 = vld [vmem:[%s2684_s3 + $0x38] sm:$0xff]   ;;  %v1849_v23 = vld [vmem:[%s2685_s4] ss:$8 sps:$4 sm:$0xff]   ;;  %s308_s12 = scalar_lea.vmem %s2689_s8, %s1556_s29 }
  0x13   : > { %1628 = vmatpush3.bf16.msra.mxu0 %v1812_v3  ;;  %1791 = vmatpush3.bf16.msra.mxu1 %v1812_v3  ;;  %v1827_v11 = vld [vmem:[%s2050_s10 + $0x4] ss:$8 sps:$4 sm:$0xff]   ;;  %v1825_v19 = vld [vmem:[%s2050_s10] ss:$8 sps:$4 sm:$0xff]   ;;  %v1828_v20 = vld [vmem:[%s2050_s10 + $0x14] ss:$8 sps:$4 sm:$0xff]  }
  0x14   : > { %1629 = vmatprep.subr.bf16.mxu0 %v1813_v4  ;;  %1784 = vmatprep.subr.bf16.mxu1 %v1813_v4  ;;  %v1839_v14 = vld [vmem:[%s2050_s10 + $0x44] ss:$8 sps:$4 sm:$0xff]   ;;  %v1837_v21 = vld [vmem:[%s2050_s10 + $0x40] ss:$8 sps:$4 sm:$0xff]   ;;  %v1840_v22 = vld [vmem:[%s2050_s10 + $0x54] ss:$8 sps:$4 sm:$0xff]  }
  0x15   : > { %582 = vmatprep.mubr.bf16.mxu0 %v1827_v11  ;;  %614 = vmatprep.mubr.bf16.mxu1 %v1839_v14  ;;  %v1854_v24 = vld [vmem:[%s2685_s4 + $0x14] ss:$8 sps:$4 sm:$0xff]   ;;  %v1852_v25 = vld [vmem:[%s2685_s4 + $0x10] ss:$8 sps:$4 sm:$0xff]   ;;  %v1857_v26 = vld [vmem:[%s2685_s4 + $0x24] ss:$8 sps:$4 sm:$0xff]  }
  0x16   : > { %v1830_v27 = vld [vmem:[%s2050_s10 + $0x10] ss:$8 sps:$4 sm:$0xff]   ;;  %v1831_v28 = vld [vmem:[%s2050_s10 + $0x24] ss:$8 sps:$4 sm:$0xff]   ;;  %v1855_v31 = vld [vmem:[%s2685_s4 + $0x20] ss:$8 sps:$4 sm:$0xff]  }
  0x17   : > { %1630 = vmatpush3.bf16.msra.mxu0 %v1814_v5  ;;  %1792 = vmatpush3.bf16.msra.mxu1 %v1814_v5  ;;  %v1842_v29 = vld [vmem:[%s2050_s10 + $0x50] ss:$8 sps:$4 sm:$0xff]   ;;  %v1843_v30 = vld [vmem:[%s2050_s10 + $0x64] ss:$8 sps:$4 sm:$0xff]   ;;  %v1860_v32 = vld [vmem:[%s2685_s4 + $0x34] ss:$8 sps:$4 sm:$0xff]  }
  0x18   : > { %1631 = vmatprep.subr.bf16.mxu0 %v1815_v6  ;;  %1785 = vmatprep.subr.bf16.mxu1 %v1815_v6  ;;  %v1858_v33 = vld [vmem:[%s2685_s4 + $0x30] ss:$8 sps:$4 sm:$0xff]   ;;  %v1863_v34 = vld [vmem:[%s2685_s4 + $0x44] ss:$8 sps:$4 sm:$0xff]   ;;  %v1833_v35 = vld [vmem:[%s2050_s10 + $0x20] ss:$8 sps:$4 sm:$0xff]  }
  0x19   : > { %v1834_v36 = vld [vmem:[%s2050_s10 + $0x34] ss:$8 sps:$4 sm:$0xff]   ;;  %v1845_v37 = vld [vmem:[%s2050_s10 + $0x60] ss:$8 sps:$4 sm:$0xff]   ;;  %v1864_v41 = vld [vmem:[%s2685_s4 + $0x50] ss:$8 sps:$4 sm:$0xff]  }
  0x1a   : > { %v1846_v38 = vld [vmem:[%s2050_s10 + $0x74] ss:$8 sps:$4 sm:$0xff]   ;;  %v1861_v39 = vld [vmem:[%s2685_s4 + $0x40] ss:$8 sps:$4 sm:$0xff]   ;;  %v1836_v42 = vld [vmem:[%s2050_s10 + $0x30] ss:$8 sps:$4 sm:$0xff]  }
  0x1b   : > { %1632 = vmatpush3.bf16.msra.mxu0 %v1816_v7  ;;  %1793 = vmatpush3.bf16.msra.mxu1 %v1816_v7  ;;  %v1866_v40 = vld [vmem:[%s2685_s4 + $0x54] ss:$8 sps:$4 sm:$0xff]   ;;  %v1848_v43 = vld [vmem:[%s2050_s10 + $0x70] ss:$8 sps:$4 sm:$0xff]   ;;  %v1869_v44 = vld [vmem:[%s2685_s4 + $0x64] ss:$8 sps:$4 sm:$0xff]  }
  0x1c   : > { %1633 = vmatprep.subr.bf16.mxu0 %v1817_v8  ;;  %1786 = vmatprep.subr.bf16.mxu1 %v1817_v8  ;;  %v1867_v45 = vld [vmem:[%s2685_s4 + $0x60] ss:$8 sps:$4 sm:$0xff]   ;;  %v1872_v46 = vld [vmem:[%s2685_s4 + $0x74] ss:$8 sps:$4 sm:$0xff]   ;;  %v1870_v47 = vld [vmem:[%s2685_s4 + $0x70] ss:$8 sps:$4 sm:$0xff]  }
  0x1d   : > { %v358_v55 = vld [vmem:[%s2682_s1] sm:$0xff]  ;;  %v359_v56 = vld [vmem:[%s2682_s1 + $0x8] sm:$0xff]  ;;  %v360_v8 = vld [vmem:[%s2682_s1 + $0x10] sm:$0xff] }
  0x1f   : > { %1634 = vmatpush3.bf16.msra.mxu0 %v1818_v9  ;;  %1794 = vmatpush3.bf16.msra.mxu1 %v1818_v9  ;;  %v361_v9 = vld [vmem:[%s2682_s1 + $0x18] sm:$0xff] }
  0x20   : > { %1635 = vmatprep.subr.bf16.mxu0 %v1819_v10  ;;  %1787 = vmatprep.subr.bf16.mxu1 %v1819_v10 }
  0x23   : > { %1636 = vmatpush3.bf16.msra.mxu0 %v1820_v12  ;;  %1795 = vmatpush3.bf16.msra.mxu1 %v1820_v12 }
  0x24   : > { %1637 = vmatprep.subr.bf16.mxu0 %v1821_v13  ;;  %1788 = vmatprep.subr.bf16.mxu1 %v1821_v13 }
  0x27   : > { %1638 = vmatpush3.bf16.msra.mxu0 %v1822_v15  ;;  %1796 = vmatpush3.bf16.msra.mxu1 %v1822_v15 }
  0x28   : > { %1639 = vmatprep.subr.bf16.mxu0 %v1823_v16  ;;  %1789 = vmatprep.subr.bf16.mxu1 %v1823_v16 }
  0x2b   : > { %1640 = vmatpush3.bf16.msra.mxu0 %v1824_v17  ;;  %1797 = vmatpush3.bf16.msra.mxu1 %v1824_v17 }
  0x2c   : > { %763 = vmatprep.subr.bf16.mxu1 %v1851_v18 }
  0x2e   : > { %583 = vmatmul.mubr.bf16.vlgmr.msra.gmra.mrb[0].mxu0 %v1825_v19  ;;  %615 = vmatmul.mubr.bf16.vlgmr.msra.gmra.mrb[0].mxu1 %v1837_v21 }
  0x2f   : > { %590 = vmatprep.mubr.bf16.mxu0 %v1828_v20  ;;  %622 = vmatprep.mubr.bf16.mxu1 %v1840_v22 }
  0x30   : > { %764 = vmatpush1.bf16.msra.mxu1 %v1849_v23 }
  0x31   : > { %765 = vmatprep.subr.bf16.mxu1 %v1854_v24 }
  0x34   : > { %766 = vmatpush1.bf16.msra.mxu1 %v1852_v25  ;;  %v362_v25 = vld [vmem:[%s2682_s1 + $0x20] sm:$0xff] }
  0x35   : > { %767 = vmatprep.subr.bf16.mxu1 %v1857_v26  ;;  %v363_v26 = vld [vmem:[%s2682_s1 + $0x28] sm:$0xff] }
  0x36   : > { %591 = vmatmul.mubr.bf16.gmra.mrb[4].mxu0 %v1830_v27  ;;  %623 = vmatmul.mubr.bf16.gmra.mrb[4].mxu1 %v1842_v29 }
  0x37   : > { %598 = vmatprep.mubr.bf16.mxu0 %v1831_v28  ;;  %630 = vmatprep.mubr.bf16.mxu1 %v1843_v30 }
  0x38   : > { %768 = vmatpush1.bf16.msra.mxu1 %v1855_v31 }
  0x39   : > { %769 = vmatprep.subr.bf16.mxu1 %v1860_v32 }
  0x3c   : > { %770 = vmatpush1.bf16.msra.mxu1 %v1858_v33 }
  0x3d   : > { %771 = vmatprep.subr.bf16.mxu1 %v1863_v34 }
  0x3e   : > { %599 = vmatmul.mubr.bf16.gmra.mrb[8].mxu0 %v1833_v35  ;;  %631 = vmatmul.mubr.bf16.gmra.mrb[8].mxu1 %v1845_v37 }
  0x3f   : > { %606 = vmatprep.mubr.bf16.mxu0 %v1834_v36  ;;  %638 = vmatprep.mubr.bf16.mxu1 %v1846_v38 }
  0x40   : > { %772 = vmatpush1.bf16.msra.mxu1 %v1861_v39 }
  0x41   : > { %773 = vmatprep.subr.bf16.mxu1 %v1866_v40 }
  0x44   : > { %774 = vmatpush1.bf16.msra.mxu1 %v1864_v41 }
  0x45   : > { %775 = vmatprep.subr.bf16.mxu1 %v1869_v44 }
  0x46   : > { %607 = vmatmul.mubr.bf16.gmra.mrb[12].mxu0 %v1836_v42  ;;  %639 = vmatmul.mubr.bf16.gmra.mrb[12].mxu1 %v1848_v43  ;;  %v364_v42 = vld [vmem:[%s2682_s1 + $0x30] sm:$0xff]  ;;  %v365_v43 = vld [vmem:[%s2682_s1 + $0x38] sm:$0xff] }
  0x47   : > { %795 = vmatprep.mubr.bf16.mxu1 %v1961_v48 }
  0x48   : > { %776 = vmatpush1.bf16.msra.mxu1 %v1867_v45 }
  0x49   : > { %777 = vmatprep.subr.bf16.mxu1 %v1872_v46 }
  0x4c   : > { %778 = vmatpush1.bf16.msra.mxu1 %v1870_v47 }
 0x101   : > { %v1641_v49 = vpop.f32.mrb[0].mxu0  ;;  %v1665_v51 = vpop.f32.mrb[0].mxu1 }
 0x102   : > { %v1642_v50 = vpop.f32.mrb[1].mxu0  ;;  %v1666_v54 = vpop.f32.mrb[1].mxu1 }
 0x103   : > { %v1643_v52 = vadd.f32 %v1642_v50, %v1641_v49  ;;  %v1644_v53 = vpop.f32.mrb[2].mxu0  ;;  %v2144_v58 = vadd.f32 %v1666_v54, %v1665_v51  ;;  %v1668_v59 = vpop.f32.mrb[2].mxu1  ;;  %v366_v54 = vld [vmem:[%s2682_s1 + $0x40] sm:$0xff] }
 0x104   : > { %v1645_v57 = vpop.f32.mrb[3].mxu0  ;;  %v1669_v61 = vpop.f32.mrb[3].mxu1 }
 0x105   : > { %v1646_v60 = vadd.f32 %v1645_v57, %v1644_v53  ;;  %v2146_v62 = vadd.f32 %v1669_v61, %v1668_v59  ;;  %v2148_v63 = vadd.f32 %v1643_v52, %v358_v55  ;;  %v367_v55 = vld [vmem:[%s2682_s1 + $0x48] sm:$0xff]  ;;  %v369_v61 = vld [vmem:[%s2682_s1 + $0x58] sm:$0xff] }
 0x107   : > { %v2150_v0 = vadd.f32 %v1646_v60, %v359_v56  ;;  %v2201_v56 = vadd.f32 %v2144_v58, %v366_v54  ;;  %v2204_v57 = vadd.f32 %v2146_v62, %v367_v55  ;;  %v368_v60 = vld [vmem:[%s2682_s1 + $0x50] sm:$0xff] }
 0x109   : > { %v647_v1 = vpack.c.bf16 %v2150_v0, %v2148_v63  ;;  %v1647_v2 = vpop.f32.mrb[4].mxu0  ;;  %v1671_v4 = vpop.f32.mrb[4].mxu1  ;;  %2697 = vst [vmem:[#allocation2_spill] sm:$0xff] %v2204_v57  ;;  %v651_v59 = vpack.c.bf16 %v2204_v57, %v2201_v56 }
 0x10a   : > { %v1648_v3 = vpop.f32.mrb[5].mxu0  ;;  %v1672_v7 = vpop.f32.mrb[5].mxu1 }
 0x10b   : > { %v1649_v5 = vadd.f32 %v1648_v3, %v1647_v2  ;;  %v1650_v6 = vpop.f32.mrb[6].mxu0  ;;  %796 = vmatmul.mubr.bf16.vlgmr.msra.gmra.mrb[16].mxu1 %v647_v1  ;;  %v1673_v11 = vadd.f32 %v1672_v7, %v1671_v4  ;;  %v1674_v12 = vpop.f32.mrb[6].mxu1  ;;  %v370_v2 = vld [vmem:[%s2682_s1 + $0x60] sm:$0xff]  ;;  %v371_v3 = vld [vmem:[%s2682_s1 + $0x68] sm:$0xff]  ;;  %v372_v7 = vld [vmem:[%s2682_s1 + $0x70] sm:$0xff] }
 0x10c   : > { %v1651_v10 = vpop.f32.mrb[7].mxu0  ;;  %805 = vmatprep.mubr.bf16.mxu1 %v1961_v48  ;;  %v1675_v14 = vpop.f32.mrb[7].mxu1 }
 0x10d   : > { %v1652_v13 = vadd.f32 %v1651_v10, %v1650_v6  ;;  %v1676_v15 = vadd.f32 %v1675_v14, %v1674_v12  ;;  %v2161_v16 = vadd.f32 %v1649_v5, %v360_v8  ;;  %v2215_v1 = vadd.f32 %v1673_v11, %v368_v60  ;;  %v373_v8 = vld [vmem:[%s2682_s1 + $0x78] sm:$0xff]  ;;  %v1873_v12 = vld [vmem:[%s2687_s6 + $0x40] sm:$0xff]   ;;  %v1876_v14 = vld [vmem:[%s2687_s6 + $0x8] sm:$0xff]  }
 0x10e   : > { %1689 = vmatprep.subr.bf16.mxu0 %v1873_v12 }
 0x10f   : > { %v2163_v17 = vadd.f32 %v1652_v13, %v361_v9  ;;  %2698 = vst [vmem:[#allocation3_spill] sm:$0xff] %v2215_v1  ;;  %v2217_v58 = vadd.f32 %v1676_v15, %v369_v61  ;;  %v1874_v13 = vld [vmem:[%s2687_s6] sm:$0xff]   ;;  %v1877_v15 = vld [vmem:[%s2687_s6 + $0x50] sm:$0xff]  }
 0x110   : > { %1690 = vmatpush3.bf16.msra.mxu0 %v1874_v13 }
 0x111   : > { %v1653_v18 = vpop.f32.mrb[8].mxu0  ;;  %v648_v19 = vpack.c.bf16 %v2163_v17, %v2161_v16  ;;  %v1677_v21 = vpop.f32.mrb[8].mxu1  ;;  %2699 = vst [vmem:[#allocation4_spill] sm:$0xff] %v2217_v58  ;;  %v652_v62 = vpack.c.bf16 %v2217_v58, %v2215_v1 }
 0x112   : > { %v1654_v20 = vpop.f32.mrb[9].mxu0  ;;  %v1678_v24 = vpop.f32.mrb[9].mxu1 }
 0x113   : > { %v1655_v22 = vadd.f32 %v1654_v20, %v1653_v18  ;;  %v1656_v23 = vpop.f32.mrb[10].mxu0  ;;  %806 = vmatmul.mubr.bf16.gmra.mrb[20].mxu1 %v648_v19  ;;  %v1679_v28 = vadd.f32 %v1678_v24, %v1677_v21  ;;  %v1680_v29 = vpop.f32.mrb[10].mxu1  ;;  %v1878_v18 = vld [vmem:[%s2687_s6 + $0x10] sm:$0xff]   ;;  %v1879_v19 = vld [vmem:[%s2687_s6 + $0x58] sm:$0xff]   ;;  %v1881_v21 = vld [vmem:[%s2687_s6 + $0x60] sm:$0xff]  }
 0x114   : > { %v1657_v27 = vpop.f32.mrb[11].mxu0  ;;  %815 = vmatprep.mubr.bf16.mxu1 %v1961_v48  ;;  %v1681_v31 = vpop.f32.mrb[11].mxu1  ;;  %v1880_v20 = vld [vmem:[%s2687_s6 + $0x18] sm:$0xff]   ;;  %v1884_v24 = vld [vmem:[%s2687_s6 + $0x28] sm:$0xff]  }
 0x115   : > { %v1658_v30 = vadd.f32 %v1657_v27, %v1656_v23  ;;  %v1682_v32 = vadd.f32 %v1681_v31, %v1680_v29  ;;  %v2174_v33 = vadd.f32 %v1655_v22, %v362_v25  ;;  %v2228_v4 = vadd.f32 %v1679_v28, %v370_v2  ;;  %v1882_v22 = vld [vmem:[%s2687_s6 + $0x20] sm:$0xff]   ;;  %v1883_v23 = vld [vmem:[%s2687_s6 + $0x68] sm:$0xff]   ;;  %v1885_v25 = vld [vmem:[%s2687_s6 + $0x70] sm:$0xff]  }
 0x116   : > { %v1887_v27 = vld [vmem:[%s2687_s6 + $0x78] sm:$0xff]   ;;  %v673_v29 = vlaneseq }
 0x117   : > { %v2176_v34 = vadd.f32 %v1658_v30, %v363_v26  ;;  %2700 = vst [vmem:[#allocation5_spill] sm:$0xff] %v2228_v4  ;;  %v2230_v5 = vadd.f32 %v1682_v32, %v371_v3  ;;  %v1886_v26 = vld [vmem:[%s2687_s6 + $0x30] sm:$0xff]   ;;  %v1888_v28 = vld [vmem:[%s2687_s6 + $0x38] sm:$0xff]   ;;  %v671_v32 = vld [vmem:[%s2686_s5] sm:$0x3] }
 0x118   : > { %v674_v30 = vshrl.u32 %v673_v29, 7 }
 0x119   : > { %v1659_v35 = vpop.f32.mrb[12].mxu0  ;;  %v649_v36 = vpack.c.bf16 %v2176_v34, %v2174_v33  ;;  %v1683_v38 = vpop.f32.mrb[12].mxu1  ;;  %2701 = vst [vmem:[#allocation6_spill] sm:$0xff] %v2230_v5  ;;  %v653_v6 = vpack.c.bf16 %v2230_v5, %v2228_v4 }
 0x11a   : > { %v1660_v37 = vpop.f32.mrb[13].mxu0  ;;  %v1684_v41 = vpop.f32.mrb[13].mxu1  ;;  %v675_v31 = vsub.s32 0, %v674_v30 }
 0x11b   : > { %v1661_v39 = vadd.f32 %v1660_v37, %v1659_v35  ;;  %v1662_v40 = vpop.f32.mrb[14].mxu0  ;;  %816 = vmatmul.mubr.bf16.gmra.mrb[24].mxu1 %v649_v36  ;;  %v1685_v45 = vadd.f32 %v1684_v41, %v1683_v38  ;;  %v1686_v46 = vpop.f32.mrb[14].mxu1  ;;  %v679_v35 = vsub.s32 1, %v674_v30 }
 0x11c   : > { %v1663_v44 = vpop.f32.mrb[15].mxu0  ;;  %825 = vmatprep.mubr.bf16.mxu1 %v1961_v48  ;;  %v1687_v49 = vpop.f32.mrb[15].mxu1  ;;  %v2298_v36 = vrot.slane %v671_v32, %v675_v31 }
 0x11d   : > { %v1664_v47 = vadd.f32 %v1663_v44, %v1662_v40  ;;  %v1688_v50 = vadd.f32 %v1687_v49, %v1686_v46  ;;  %v2187_v51 = vadd.f32 %v1661_v39, %v364_v42  ;;  %v2241_v9 = vadd.f32 %v1685_v45, %v372_v7 }
 0x11e   : > { %v2300_v37 = vrot.slane %v671_v32, %v679_v35 }
 0x11f   : > { %v2189_v52 = vadd.f32 %v1664_v47, %v365_v43  ;;  %2702 = vst [vmem:[#allocation7_spill] sm:$0xff] %v2241_v9  ;;  %v2243_v10 = vadd.f32 %v1688_v50, %v373_v8 }
 0x121   : > { %v650_v53 = vpack.c.bf16 %v2189_v52, %v2187_v51  ;;  %2703 = vst [vmem:[#allocation8_spill] sm:$0xff] %v2243_v10  ;;  %v654_v11 = vpack.c.bf16 %v2243_v10, %v2241_v9 }
 0x123   : > { %826 = vmatmul.mubr.bf16.gmra.mrb[28].mxu1 %v650_v53 }
 0x124   : > { %835 = vmatprep.mubr.bf16.mxu1 %v1961_v48 }
 0x12b   : > { %836 = vmatmul.mubr.bf16.gmra.mrb[32].mxu1 %v651_v59 }
 0x12c   : > { %845 = vmatprep.mubr.bf16.mxu1 %v1961_v48 }
 0x133   : > { %846 = vmatmul.mubr.bf16.gmra.mrb[36].mxu1 %v652_v62 }
 0x134   : > { %855 = vmatprep.mubr.bf16.mxu1 %v1961_v48 }
 0x13b   : > { %856 = vmatmul.mubr.bf16.gmra.mrb[40].mxu1 %v653_v6 }
 0x13c   : > { %865 = vmatprep.mubr.bf16.mxu1 %v1961_v48  ;;  %v1875_v48 = vld [vmem:[%s2687_s6 + $0x48] sm:$0xff]  }
 0x13d   : > { %1691 = vmatprep.subr.bf16.mxu0 %v1875_v48 }
 0x13e   : > { %1692 = vmatpush3.bf16.msra.mxu0 %v1876_v14 }
 0x13f   : > { %1693 = vmatprep.subr.bf16.mxu0 %v1877_v15 }
 0x142   : > { %1694 = vmatpush3.bf16.msra.mxu0 %v1878_v18 }
 0x143   : > { %866 = vmatmul.mubr.bf16.gmra.mrb[44].mxu1 %v654_v11  ;;  %1695 = vmatprep.subr.bf16.mxu0 %v1879_v19 }
 0x146   : > { %1696 = vmatpush3.bf16.msra.mxu0 %v1880_v20 }
 0x147   : > { %1697 = vmatprep.subr.bf16.mxu0 %v1881_v21 }
 0x14a   : > { %1698 = vmatpush3.bf16.msra.mxu0 %v1882_v22 }
 0x14b   : > { %1699 = vmatprep.subr.bf16.mxu0 %v1883_v23 }
 0x14e   : > { %1700 = vmatpush3.bf16.msra.mxu0 %v1884_v24 }
 0x14f   : > { %1701 = vmatprep.subr.bf16.mxu0 %v1885_v25 }
 0x152   : > { %1702 = vmatpush3.bf16.msra.mxu0 %v1886_v26 }
 0x153   : > { %1703 = vmatprep.subr.bf16.mxu0 %v1887_v27 }
 0x156   : > { %1704 = vmatpush3.bf16.msra.mxu0 %v1888_v28 }
 0x1de   : > { %v797_v38 = vpop.f32.mrb[16].mxu1 }
 0x1df   : > { %v2303_v39 = vadd.f32 %v797_v38, %v2298_v36  ;;  %v799_v40 = vpop.f32.mrb[17].mxu1 }
 0x1e0   : > { %v2306_v41 = vadd.f32 %v799_v40, %v2300_v37  ;;  %v801_v42 = vpop.f32.mrb[18].mxu1 }
 0x1e1   : > { %v876_v43 = vmul.f32 %v2303_v39, %v2303_v39  ;;  %v2311_v44 = vadd.f32 %v801_v42, %v2298_v36  ;;  %v803_v45 = vpop.f32.mrb[19].mxu1 }
 0x1e2   : > { %v877_v46 = vmul.f32 %v2306_v41, %v2306_v41  ;;  %v2316_v47 = vadd.f32 %v803_v45, %v2300_v37 }
 0x1e3   : > { %v908_v49 = vmul.f32 %v876_v43, %v2303_v39  ;;  %v878_v50 = vmul.f32 %v2311_v44, %v2311_v44 }
 0x1e4   : > { %v909_v53 = vmul.f32 %v877_v46, %v2306_v41  ;;  %v879_v54 = vmul.f32 %v2316_v47, %v2316_v47 }
 0x1e5   : > { %v940_v55 = vmul.f32 0.044715, %v908_v49  ;;  %v910_v59 = vmul.f32 %v878_v50, %v2311_v44 }
 0x1e6   : > { %v941_v60 = vmul.f32 0.044715, %v909_v53  ;;  %v911_v61 = vmul.f32 %v879_v54, %v2316_v47  ;;  %v807_v62 = vpop.f32.mrb[20].mxu1 }
 0x1e7   : > { %v972_v2 = vadd.f32 %v940_v55, %v2303_v39  ;;  %v942_v3 = vmul.f32 0.044715, %v910_v59  ;;  %v2328_v6 = vadd.f32 %v807_v62, %v2298_v36  ;;  %v809_v7 = vpop.f32.mrb[21].mxu1 }
 0x1e8   : > { %v973_v8 = vadd.f32 %v941_v60, %v2306_v41  ;;  %v943_v11 = vmul.f32 0.044715, %v911_v61  ;;  %v2332_v12 = vadd.f32 %v809_v7, %v2300_v37  ;;  %v811_v13 = vpop.f32.mrb[22].mxu1 }
 0x1e9   : > { %v1004_v48 = vmul.f32 0.7978846, %v972_v2  ;;  %v974_v14 = vadd.f32 %v942_v3, %v2311_v44  ;;  %v880_v15 = vmul.f32 %v2328_v6, %v2328_v6  ;;  %v2338_v18 = vadd.f32 %v811_v13, %v2298_v36  ;;  %v813_v19 = vpop.f32.mrb[23].mxu1 }
 0x1ea   : > { %v1005_v20 = vmul.f32 0.7978846, %v973_v8  ;;  %v975_v21 = vadd.f32 %v943_v11, %v2316_v47  ;;  %v881_v22 = vmul.f32 %v2332_v12, %v2332_v12  ;;  %v2344_v23 = vadd.f32 %v813_v19, %v2300_v37 }
 0x1eb   : > { %1889 = vtanh.f32 %v1004_v48  ;;  %v1006_v24 = vmul.f32 0.7978846, %v974_v14  ;;  %v912_v25 = vmul.f32 %v880_v15, %v2328_v6  ;;  %v882_v26 = vmul.f32 %v2338_v18, %v2338_v18 }
 0x1ec   : > { %1891 = vtanh.f32 %v1005_v20  ;;  %v1007_v27 = vmul.f32 0.7978846, %v975_v21  ;;  %v913_v28 = vmul.f32 %v881_v22, %v2332_v12  ;;  %v883_v29 = vmul.f32 %v2344_v23, %v2344_v23 }
 0x1ed   : > { %1893 = vtanh.f32 %v1006_v24  ;;  %v944_v30 = vmul.f32 0.044715, %v912_v25  ;;  %v914_v31 = vmul.f32 %v882_v26, %v2338_v18 }
 0x1ee   : > { %v945_v32 = vmul.f32 0.044715, %v913_v28  ;;  %v915_v35 = vmul.f32 %v883_v29, %v2344_v23  ;;  %v817_v38 = vpop.f32.mrb[24].mxu1  ;;  %1895 = vtanh.f32 %v1007_v27 }
 0x1ef   : > { %v976_v40 = vadd.f32 %v944_v30, %v2328_v6  ;;  %v946_v42 = vmul.f32 0.044715, %v914_v31  ;;  %v2356_v43 = vadd.f32 %v817_v38, %v2298_v36  ;;  %v819_v45 = vpop.f32.mrb[25].mxu1 }
 0x1f0   : > { %v977_v46 = vadd.f32 %v945_v32, %v2332_v12  ;;  %v947_v49 = vmul.f32 0.044715, %v915_v35  ;;  %v2360_v50 = vadd.f32 %v819_v45, %v2300_v37  ;;  %v821_v53 = vpop.f32.mrb[26].mxu1 }
 0x1f1   : > { %v1008_v54 = vmul.f32 0.7978846, %v976_v40  ;;  %v978_v55 = vadd.f32 %v946_v42, %v2338_v18  ;;  %v884_v59 = vmul.f32 %v2356_v43, %v2356_v43  ;;  %v2366_v60 = vadd.f32 %v821_v53, %v2298_v36  ;;  %v823_v61 = vpop.f32.mrb[27].mxu1 }
 0x1f2   : > { %v1009_v62 = vmul.f32 0.7978846, %v977_v46  ;;  %v979_v2 = vadd.f32 %v947_v49, %v2344_v23  ;;  %v885_v3 = vmul.f32 %v2360_v50, %v2360_v50  ;;  %v2372_v7 = vadd.f32 %v823_v61, %v2300_v37 }
 0x1f3   : > { %1897 = vtanh.f32 %v1008_v54  ;;  %v1010_v8 = vmul.f32 0.7978846, %v978_v55  ;;  %v916_v11 = vmul.f32 %v884_v59, %v2356_v43  ;;  %v886_v13 = vmul.f32 %v2366_v60, %v2366_v60 }
 0x1f4   : > { %1899 = vtanh.f32 %v1009_v62  ;;  %v1011_v48 = vmul.f32 0.7978846, %v979_v2  ;;  %v917_v14 = vmul.f32 %v885_v3, %v2360_v50  ;;  %v887_v15 = vmul.f32 %v2372_v7, %v2372_v7 }
 0x1f5   : > { %v1890_v19 = vpop.eup %1889  ;;  %1901 = vtanh.f32 %v1010_v8  ;;  %v948_v20 = vmul.f32 0.044715, %v916_v11  ;;  %v918_v21 = vmul.f32 %v886_v13, %v2366_v60 }
 0x1f6   : > { %v1892_v22 = vpop.eup %1891  ;;  %v1068_v24 = vadd.f32 1.0, %v1890_v19  ;;  %1903 = vtanh.f32 %v1011_v48  ;;  %v949_v25 = vmul.f32 0.044715, %v917_v14  ;;  %v919_v26 = vmul.f32 %v887_v15, %v2372_v7  ;;  %v827_v27 = vpop.f32.mrb[28].mxu1 }
 0x1f7   : > { %v1894_v28 = vpop.eup %1893  ;;  %v980_v29 = vadd.f32 %v948_v20, %v2356_v43  ;;  %v950_v30 = vmul.f32 0.044715, %v918_v21  ;;  %v2384_v31 = vadd.f32 %v827_v27, %v2298_v36  ;;  %v829_v32 = vpop.f32.mrb[29].mxu1  ;;  %v1069_v35 = vadd.f32 1.0, %v1892_v22 }
 0x1f8   : > { %v1100_v38 = vmul.f32 0.5, %v1068_v24  ;;  %v1070_v40 = vadd.f32 1.0, %v1894_v28  ;;  %v981_v42 = vadd.f32 %v949_v25, %v2360_v50  ;;  %v951_v45 = vmul.f32 0.044715, %v919_v26  ;;  %v831_v46 = vpop.f32.mrb[30].mxu1  ;;  %v1896_v61 = vpop.eup %1895 }
 0x1f9   : > { %v1012_v49 = vmul.f32 0.7978846, %v980_v29  ;;  %v982_v53 = vadd.f32 %v950_v30, %v2366_v60  ;;  %v888_v54 = vmul.f32 %v2384_v31, %v2384_v31  ;;  %v2391_v55 = vadd.f32 %v829_v32, %v2300_v37  ;;  %v833_v59 = vpop.f32.mrb[31].mxu1 }
 0x1fa   : > { %v2394_v62 = vmul.f32 %v1100_v38, %v2303_v39  ;;  %v1102_v2 = vmul.f32 0.5, %v1070_v40  ;;  %v1013_v3 = vmul.f32 0.7978846, %v981_v42  ;;  %v983_v8 = vadd.f32 %v951_v45, %v2372_v7 }
 0x1fb   : > { %1905 = vtanh.f32 %v1012_v49  ;;  %v1014_v11 = vmul.f32 0.7978846, %v982_v53  ;;  %v920_v13 = vmul.f32 %v888_v54, %v2384_v31  ;;  %v889_v48 = vmul.f32 %v2391_v55, %v2391_v55 }
 0x1fc   : > { %v2401_v14 = vmul.f32 %v1102_v2, %v2311_v44  ;;  %1907 = vtanh.f32 %v1013_v3  ;;  %v1015_v15 = vmul.f32 0.7978846, %v983_v8  ;;  %v2404_v19 = vadd.f32 %v831_v46, %v2298_v36 }
 0x1fd   : > { %v2406_v39 = vpop.eup %1897  ;;  %1909 = vtanh.f32 %v1014_v11  ;;  %v952_v20 = vmul.f32 0.044715, %v920_v13  ;;  %v921_v21 = vmul.f32 %v889_v48, %v2391_v55  ;;  %v2410_v22 = vadd.f32 %v833_v59, %v2300_v37 }
 0x1fe   : > { %v2412_v24 = vpop.eup %1899  ;;  %1911 = vtanh.f32 %v1015_v15  ;;  %v890_v25 = vmul.f32 %v2404_v19, %v2404_v19  ;;  %v837_v26 = vpop.f32.mrb[32].mxu1  ;;  %v1071_v27 = vadd.f32 1.0, %v1896_v61  ;;  %v1101_v53 = vmul.f32 0.5, %v1069_v35 }
 0x1ff   : > { %v2418_v28 = vpop.eup %1901  ;;  %v984_v29 = vadd.f32 %v952_v20, %v2384_v31  ;;  %v953_v30 = vmul.f32 0.044715, %v921_v21  ;;  %v891_v32 = vmul.f32 %v2410_v22, %v2410_v22  ;;  %v2424_v38 = vadd.f32 %v837_v26, %v2298_v36  ;;  %v839_v40 = vpop.f32.mrb[33].mxu1 }
 0x200   : > { %v2426_v42 = vpop.eup %1903  ;;  %v922_v45 = vmul.f32 %v890_v25, %v2404_v19  ;;  %v2430_v46 = vadd.f32 %v839_v40, %v2300_v37  ;;  %v841_v49 = vpop.f32.mrb[34].mxu1  ;;  %v1103_v54 = vmul.f32 0.5, %v1071_v27 }
 0x201   : > { %v1016_v59 = vmul.f32 0.7978846, %v984_v29  ;;  %v985_v61 = vadd.f32 %v953_v30, %v2391_v55  ;;  %v923_v2 = vmul.f32 %v891_v32, %v2410_v22  ;;  %v892_v3 = vmul.f32 %v2424_v38, %v2424_v38  ;;  %v843_v8 = vpop.f32.mrb[35].mxu1 }
 0x202   : > { %v954_v11 = vmul.f32 0.044715, %v922_v45  ;;  %v893_v13 = vmul.f32 %v2430_v46, %v2430_v46  ;;  %v2439_v48 = vadd.f32 %v841_v49, %v2298_v36  ;;  %v2442_v15 = vadd.f32 %v843_v8, %v2300_v37 }
 0x203   : > { %1913 = vtanh.f32 %v1016_v59  ;;  %v1017_v35 = vmul.f32 0.7978846, %v985_v61  ;;  %v955_v20 = vmul.f32 0.044715, %v923_v2  ;;  %v924_v21 = vmul.f32 %v892_v3, %v2424_v38 }
 0x204   : > { %v986_v25 = vadd.f32 %v954_v11, %v2404_v19  ;;  %v925_v26 = vmul.f32 %v893_v13, %v2430_v46  ;;  %v894_v27 = vmul.f32 %v2439_v48, %v2439_v48  ;;  %v895_v29 = vmul.f32 %v2442_v15, %v2442_v15 }
 0x205   : > { %v2451_v30 = vpop.eup %1905  ;;  %1915 = vtanh.f32 %v1017_v35  ;;  %v987_v32 = vadd.f32 %v955_v20, %v2410_v22  ;;  %v956_v40 = vmul.f32 0.044715, %v924_v21  ;;  %v1133_v45 = vmul.f32 %v1101_v53, %v2306_v41 }
 0x206   : > { %v2455_v49 = vpop.eup %1907  ;;  %v1018_v59 = vmul.f32 0.7978846, %v986_v25  ;;  %v957_v61 = vmul.f32 0.044715, %v925_v26  ;;  %v926_v2 = vmul.f32 %v894_v27, %v2439_v48  ;;  %v927_v3 = vmul.f32 %v895_v29, %v2442_v15  ;;  %v847_v8 = vpop.f32.mrb[36].mxu1 }
 0x207   : > { %v2459_v11 = vpop.eup %1909  ;;  %v1019_v13 = vmul.f32 0.7978846, %v987_v32  ;;  %v988_v44 = vadd.f32 %v956_v40, %v2424_v38  ;;  %v1135_v35 = vmul.f32 %v1103_v54, %v2316_v47  ;;  %v2464_v20 = vadd.f32 %v847_v8, %v2298_v36  ;;  %v849_v41 = vpop.f32.mrb[37].mxu1 }
 0x208   : > { %v2466_v53 = vpop.eup %1911  ;;  %1917 = vtanh.f32 %v1018_v59  ;;  %v989_v21 = vadd.f32 %v957_v61, %v2430_v46  ;;  %v958_v25 = vmul.f32 0.044715, %v926_v2  ;;  %v959_v26 = vmul.f32 0.044715, %v927_v3  ;;  %v851_v27 = vpop.f32.mrb[38].mxu1 }
 0x209   : > { %1919 = vtanh.f32 %v1019_v13  ;;  %v1020_v29 = vmul.f32 0.7978846, %v988_v44  ;;  %v1165_v10 = vpack.c.bf16 %v1135_v35, %v1133_v45  ;;  %v896_v32 = vmul.f32 %v2464_v20, %v2464_v20  ;;  %v853_v40 = vpop.f32.mrb[39].mxu1 }
 0x20a   : > { %v1021_v47 = vmul.f32 0.7978846, %v989_v21  ;;  %v990_v54 = vadd.f32 %v958_v25, %v2439_v48  ;;  %v991_v8 = vadd.f32 %v959_v26, %v2442_v15  ;;  %v2474_v9 = vadd.f32 %v849_v41, %v2300_v37 }
 0x20b   : > { %1921 = vtanh.f32 %v1020_v29  ;;  %1340 = vmatprep.mubr.bf16.mxu0 %v1165_v10  ;;  %v928_v59 = vmul.f32 %v896_v32, %v2464_v20  ;;  %v2478_v61 = vadd.f32 %v851_v27, %v2298_v36  ;;  %v2481_v44 = vadd.f32 %v853_v40, %v2300_v37 }
 0x20c   : > { %1923 = vtanh.f32 %v1021_v47  ;;  %v1022_v45 = vmul.f32 0.7978846, %v990_v54  ;;  %v1023_v2 = vmul.f32 0.7978846, %v991_v8  ;;  %v2704_v3 = vpack.c.bf16 %v2401_v14, %v2394_v62 }
 0x20d   : > { %v897_v13 = vmul.f32 %v2474_v9, %v2474_v9  ;;  %v2488_v35 = vpop.eup %1913  ;;  %v960_v10 = vmul.f32 0.044715, %v928_v59  ;;  %v898_v41 = vmul.f32 %v2478_v61, %v2478_v61  ;;  %v899_v21 = vmul.f32 %v2481_v44, %v2481_v44 }
 0x20e   : > { %1341 = vmatmul.mubr.bf16.vlgmr.msra.gmra.mrb[16].mxu0 %v2704_v3  ;;  %v1073_v25 = vadd.f32 1.0, %v2412_v24  ;;  %1925 = vtanh.f32 %v1022_v45  ;;  %v1075_v62 = vadd.f32 1.0, %v2426_v42  ;;  %v1072_v14 = vadd.f32 1.0, %v2406_v39  ;;  %v857_v27 = vpop.f32.mrb[40].mxu1 }
 0x20f   : > { %v929_v26 = vmul.f32 %v897_v13, %v2474_v9  ;;  %v2498_v29 = vpop.eup %1915  ;;  %1927 = vtanh.f32 %v1023_v2  ;;  %v992_v32 = vadd.f32 %v960_v10, %v2464_v20  ;;  %v930_v40 = vmul.f32 %v898_v41, %v2478_v61  ;;  %v859_v54 = vpop.f32.mrb[41].mxu1 }
 0x210   : > { %v931_v47 = vmul.f32 %v899_v21, %v2481_v44  ;;  %v1105_v24 = vmul.f32 0.5, %v1073_v25  ;;  %v1107_v59 = vmul.f32 0.5, %v1075_v62  ;;  %v1074_v45 = vadd.f32 1.0, %v2418_v28  ;;  %v861_v3 = vpop.f32.mrb[42].mxu1 }
 0x211   : > { %v961_v8 = vmul.f32 0.044715, %v929_v26  ;;  %v1024_v42 = vmul.f32 0.7978846, %v992_v32  ;;  %v962_v13 = vmul.f32 0.044715, %v930_v40  ;;  %v2505_v5 = vadd.f32 %v857_v27, %v2298_v36 }
 0x212   : > { %v963_v39 = vmul.f32 0.044715, %v931_v47  ;;  %v2507_v2 = vpop.eup %1917  ;;  %v1137_v41 = vmul.f32 %v1105_v24, %v2332_v12  ;;  %v1139_v21 = vmul.f32 %v1107_v59, %v2344_v23  ;;  %v1104_v26 = vmul.f32 0.5, %v1072_v14  ;;  %v863_v25 = vpop.f32.mrb[43].mxu1 }
 0x213   : > { %v993_v10 = vadd.f32 %v961_v8, %v2474_v9  ;;  %v2512_v62 = vpop.eup %1919  ;;  %1929 = vtanh.f32 %v1024_v42  ;;  %v994_v28 = vadd.f32 %v962_v13, %v2478_v61  ;;  %v1106_v40 = vmul.f32 0.5, %v1074_v45 }
 0x214   : > { %v995_v32 = vadd.f32 %v963_v39, %v2481_v44  ;;  %v1167_v47 = vpack.c.bf16 %v1139_v21, %v1137_v41  ;;  %v1136_v4 = vmul.f32 %v1104_v26, %v2328_v6  ;;  %v900_v8 = vmul.f32 %v2505_v5, %v2505_v5 }
 0x215   : > { %v1025_v27 = vmul.f32 0.7978846, %v993_v10  ;;  %v2519_v12 = vpop.eup %1921  ;;  %v1026_v23 = vmul.f32 0.7978846, %v994_v28  ;;  %v1138_v24 = vmul.f32 %v1106_v40, %v2338_v18  ;;  %v2523_v59 = vadd.f32 %v859_v54, %v2300_v37 }
 0x216   : > { %v1027_v14 = vmul.f32 0.7978846, %v995_v32  ;;  %v2525_v42 = vpop.eup %1923  ;;  %1348 = vmatprep.mubr.bf16.mxu0 %v1167_v47  ;;  %v932_v45 = vmul.f32 %v900_v8, %v2505_v5  ;;  %v2529_v6 = vadd.f32 %v861_v3, %v2298_v36  ;;  %v2532_v13 = vadd.f32 %v863_v25, %v2300_v37  ;;  %v867_v39 = vpop.f32.mrb[44].mxu1 }
 0x217   : > { %1931 = vtanh.f32 %v1025_v27  ;;  %v1166_v10 = vpack.c.bf16 %v1138_v24, %v1136_v4  ;;  %v901_v18 = vmul.f32 %v2523_v59, %v2523_v59  ;;  %v1077_v54 = vadd.f32 1.0, %v2455_v49  ;;  %v869_v41 = vpop.f32.mrb[45].mxu1 }
 0x218   : > { %1933 = vtanh.f32 %v1026_v23  ;;  %v2537_v21 = vpop.eup %1925  ;;  %v964_v26 = vmul.f32 0.044715, %v932_v45  ;;  %v902_v3 = vmul.f32 %v2529_v6, %v2529_v6  ;;  %v903_v25 = vmul.f32 %v2532_v13, %v2532_v13  ;;  %v871_v28 = vpop.f32.mrb[46].mxu1 }
 0x219   : > { %1935 = vtanh.f32 %v1027_v14  ;;  %v2543_v32 = vpop.eup %1927  ;;  %1349 = vmatmul.mubr.bf16.gmra.mrb[20].mxu0 %v1166_v10  ;;  %v933_v4 = vmul.f32 %v901_v18, %v2523_v59  ;;  %v1079_v40 = vadd.f32 1.0, %v2466_v53  ;;  %v1109_v49 = vmul.f32 0.5, %v1077_v54  ;;  %v873_v47 = vpop.f32.mrb[47].mxu1 }
 0x21a   : > { %v1076_v27 = vadd.f32 1.0, %v2451_v30  ;;  %v996_v8 = vadd.f32 %v964_v26, %v2505_v5  ;;  %v934_v23 = vmul.f32 %v902_v3, %v2529_v6  ;;  %v935_v14 = vmul.f32 %v903_v25, %v2532_v13 }
 0x21b   : > { %v1078_v24 = vadd.f32 1.0, %v2459_v11  ;;  %v965_v45 = vmul.f32 0.044715, %v933_v4  ;;  %v1111_v58 = vmul.f32 0.5, %v1079_v40  ;;  %v1141_v10 = vmul.f32 %v1109_v49, %v2360_v50 }
 0x21c   : > { %v1108_v1 = vmul.f32 0.5, %v1076_v27  ;;  %v1028_v18 = vmul.f32 0.7978846, %v996_v8  ;;  %v966_v57 = vmul.f32 0.044715, %v934_v23  ;;  %v2554_v54 = vadd.f32 %v867_v39, %v2298_v36 }
 0x21d   : > { %v967_v53 = vmul.f32 0.044715, %v935_v14  ;;  %v2556_v30 = vpop.eup %1929  ;;  %v997_v26 = vadd.f32 %v965_v45, %v2523_v59  ;;  %v1143_v3 = vmul.f32 %v1111_v58, %v2372_v7  ;;  %v1110_v25 = vmul.f32 0.5, %v1078_v24 }
 0x21e   : > { %v1140_v11 = vmul.f32 %v1108_v1, %v2356_v43  ;;  %1937 = vtanh.f32 %v1028_v18  ;;  %v998_v4 = vadd.f32 %v966_v57, %v2529_v6  ;;  %v904_v40 = vmul.f32 %v2554_v54, %v2554_v54 }
 0x21f   : > { %v999_v50 = vadd.f32 %v967_v53, %v2532_v13  ;;  %v1029_v49 = vmul.f32 0.7978846, %v997_v26  ;;  %v1169_v39 = vpack.c.bf16 %v1143_v3, %v1141_v10  ;;  %v1142_v27 = vmul.f32 %v1110_v25, %v2366_v60 }
 0x220   : > { %v2567_v8 = vadd.f32 %v869_v41, %v2300_v37  ;;  %v1030_v58 = vmul.f32 0.7978846, %v998_v4  ;;  %v936_v1 = vmul.f32 %v904_v40, %v2554_v54  ;;  %v2573_v57 = vadd.f32 %v871_v28, %v2298_v36 }
 0x221   : > { %v2569_v23 = vpop.eup %1931  ;;  %v1031_v7 = vmul.f32 0.7978846, %v999_v50  ;;  %1939 = vtanh.f32 %v1029_v49  ;;  %1356 = vmatprep.mubr.bf16.mxu0 %v1169_v39  ;;  %v1168_v14 = vpack.c.bf16 %v1142_v27, %v1140_v11  ;;  %v2580_v41 = vadd.f32 %v873_v47, %v2300_v37 }
 0x222   : > { %v2575_v43 = vpop.eup %1933  ;;  %v905_v60 = vmul.f32 %v2567_v8, %v2567_v8  ;;  %1941 = vtanh.f32 %v1030_v58  ;;  %v968_v45 = vmul.f32 0.044715, %v936_v1  ;;  %v906_v10 = vmul.f32 %v2573_v57, %v2573_v57 }
 0x223   : > { %v1936_v24 = vpop.eup %1935  ;;  %v1081_v36 = vadd.f32 1.0, %v2498_v29  ;;  %1943 = vtanh.f32 %v1031_v7  ;;  %1357 = vmatmul.mubr.bf16.gmra.mrb[24].mxu0 %v1168_v14  ;;  %v907_v18 = vmul.f32 %v2580_v41, %v2580_v41  ;;  %v1083_v53 = vadd.f32 1.0, %v2512_v62 }
 0x224   : > { %v937_v28 = vmul.f32 %v905_v60, %v2567_v8  ;;  %v1000_v37 = vadd.f32 %v968_v45, %v2554_v54  ;;  %v938_v47 = vmul.f32 %v906_v10, %v2573_v57  ;;  %v1080_v3 = vadd.f32 1.0, %v2488_v35 }
 0x225   : > { %v1113_v26 = vmul.f32 0.5, %v1081_v36  ;;  %v939_v11 = vmul.f32 %v907_v18, %v2580_v41  ;;  %v1115_v29 = vmul.f32 0.5, %v1083_v53  ;;  %v1082_v4 = vadd.f32 1.0, %v2507_v2 }
 0x226   : > { %v969_v25 = vmul.f32 0.044715, %v937_v28  ;;  %v1032_v50 = vmul.f32 0.7978846, %v1000_v37  ;;  %v970_v40 = vmul.f32 0.044715, %v938_v47 }
 0x227   : > { %v1145_v49 = vmul.f32 %v1113_v26, %v2391_v55  ;;  %v1112_v39 = vmul.f32 0.5, %v1080_v3  ;;  %v971_v27 = vmul.f32 0.044715, %v939_v11  ;;  %v1147_v58 = vmul.f32 %v1115_v29, %v2410_v22 }
 0x228   : > { %v1001_v62 = vadd.f32 %v969_v25, %v2567_v8  ;;  %v1114_v7 = vmul.f32 0.5, %v1082_v4  ;;  %v1938_v1 = vpop.eup %1937  ;;  %1945 = vtanh.f32 %v1032_v50  ;;  %v1002_v35 = vadd.f32 %v970_v40, %v2573_v57 }
 0x229   : > { %v1144_v14 = vmul.f32 %v1112_v39, %v2384_v31  ;;  %v1085_v60 = vadd.f32 1.0, %v2525_v42  ;;  %v1003_v45 = vadd.f32 %v971_v27, %v2580_v41  ;;  %v1171_v10 = vpack.c.bf16 %v1147_v58, %v1145_v49 }
 0x22a   : > { %v1033_v2 = vmul.f32 0.7978846, %v1001_v62  ;;  %v1146_v55 = vmul.f32 %v1114_v7, %v2404_v19  ;;  %v1034_v36 = vmul.f32 0.7978846, %v1002_v35  ;;  %v1087_v28 = vadd.f32 1.0, %v2543_v32 }
 0x22b   : > { %v1117_v18 = vmul.f32 0.5, %v1085_v60  ;;  %v1084_v22 = vadd.f32 1.0, %v2519_v12  ;;  %v1940_v53 = vpop.eup %1939  ;;  %v1035_v37 = vmul.f32 0.7978846, %v1003_v45  ;;  %1364 = vmatprep.mubr.bf16.mxu0 %v1171_v10  ;;  %v1086_v31 = vadd.f32 1.0, %v2537_v21 }
 0x22c   : > { %1947 = vtanh.f32 %v1033_v2  ;;  %v1170_v47 = vpack.c.bf16 %v1146_v55, %v1144_v14  ;;  %v1942_v42 = vpop.eup %1941  ;;  %v1119_v26 = vmul.f32 0.5, %v1087_v28  ;;  %v1089_v11 = vadd.f32 1.0, %v2569_v23 }
 0x22d   : > { %1949 = vtanh.f32 %v1034_v36  ;;  %v1149_v3 = vmul.f32 %v1117_v18, %v2430_v46  ;;  %v1116_v25 = vmul.f32 0.5, %v1084_v22  ;;  %v1944_v19 = vpop.eup %1943  ;;  %v1118_v32 = vmul.f32 0.5, %v1086_v31 }
 0x22e   : > { %1951 = vtanh.f32 %v1035_v37  ;;  %1365 = vmatmul.mubr.bf16.gmra.mrb[28].mxu0 %v1170_v47  ;;  %v1091_v12 = vadd.f32 1.0, %v1936_v24  ;;  %v1151_v29 = vmul.f32 %v1119_v26, %v2442_v15  ;;  %v1088_v50 = vadd.f32 1.0, %v2556_v30 }
 0x22f   : > { %v1148_v4 = vmul.f32 %v1116_v25, %v2424_v38  ;;  %v1090_v21 = vadd.f32 1.0, %v2575_v43  ;;  %v1150_v40 = vmul.f32 %v1118_v32, %v2439_v48  ;;  %v1121_v49 = vmul.f32 0.5, %v1089_v11 }
 0x230   : > { %v1123_v46 = vmul.f32 0.5, %v1091_v12  ;;  %v1093_v39 = vadd.f32 1.0, %v1940_v53  ;;  %v1173_v62 = vpack.c.bf16 %v1151_v29, %v1149_v3  ;;  %v1120_v27 = vmul.f32 0.5, %v1088_v50  ;;  %v2630_v50 = vld [vmem:[%s2688_s7] ss:$0 sm:$0xff] }
 0x231   : > { %v1122_v58 = vmul.f32 0.5, %v1090_v21  ;;  %v1095_v7 = vadd.f32 1.0, %v1944_v19  ;;  %v1172_v35 = vpack.c.bf16 %v1150_v40, %v1148_v4  ;;  %v1153_v23 = vmul.f32 %v1121_v49, %v2474_v9 }
 0x232   : > { %v1155_v15 = vmul.f32 %v1123_v46, %v2481_v44  ;;  %v1125_v24 = vmul.f32 0.5, %v1093_v39  ;;  %v1946_v38 = vpop.eup %1945  ;;  %1372 = vmatprep.mubr.bf16.mxu0 %v1173_v62  ;;  %v1152_v30 = vmul.f32 %v1120_v27, %v2464_v20  ;;  %v1092_v14 = vadd.f32 1.0, %v1938_v1 }
 0x233   : > { %v1154_v43 = vmul.f32 %v1122_v58, %v2478_v61  ;;  %v1127_v48 = vmul.f32 0.5, %v1095_v7  ;;  %v1094_v2 = vadd.f32 1.0, %v1942_v42  ;;  %v1096_v45 = vadd.f32 1.0, %v1946_v38 }
 0x234   : > { %v1175_v60 = vpack.c.bf16 %v1155_v15, %v1153_v23  ;;  %v1157_v55 = vmul.f32 %v1125_v24, %v2523_v59  ;;  %v1124_v9 = vmul.f32 0.5, %v1092_v14 }
 0x235   : > { %v1174_v10 = vpack.c.bf16 %v1154_v43, %v1152_v30  ;;  %v1159_v36 = vmul.f32 %v1127_v48, %v2532_v13  ;;  %v1126_v44 = vmul.f32 0.5, %v1094_v2  ;;  %v1128_v47 = vmul.f32 0.5, %v1096_v45 }
 0x236   : > { %v1948_v28 = vpop.eup %1947  ;;  %1373 = vmatmul.mubr.bf16.gmra.mrb[32].mxu0 %v1172_v35  ;;  %v1156_v61 = vmul.f32 %v1124_v9, %v2505_v5 }
 0x237   : > { %v1950_v18 = vpop.eup %1949  ;;  %1380 = vmatprep.mubr.bf16.mxu0 %v1175_v60  ;;  %v1177_v22 = vpack.c.bf16 %v1159_v36, %v1157_v55  ;;  %v1097_v20 = vadd.f32 1.0, %v1948_v28  ;;  %v1158_v1 = vmul.f32 %v1126_v44, %v2529_v6  ;;  %v1160_v3 = vmul.f32 %v1128_v47, %v2554_v54 }
 0x238   : > { %v1952_v53 = vpop.eup %1951  ;;  %v1098_v37 = vadd.f32 1.0, %v1950_v18  ;;  %v1962_v6 = vmov 0.0  }
 0x239   : > { %v1099_v31 = vadd.f32 1.0, %v1952_v53  ;;  %v1129_v42 = vmul.f32 0.5, %v1097_v20  ;;  %v1176_v59 = vpack.c.bf16 %v1158_v1, %v1156_v61  ;;  %1762 = vmatprep.subr.bf16.mxu1 %v1962_v6  ;;  %1778 = vmatprep.mubr.msk.bf16.mxu1 %vm1963_vm0, %v1962_v6 }
 0x23a   : > { %v1130_v26 = vmul.f32 0.5, %v1098_v37 }
 0x23b   : > { %v1131_v13 = vmul.f32 0.5, %v1099_v31  ;;  %v1161_v19 = vmul.f32 %v1129_v42, %v2567_v8 }
 0x23c   : > { %v1162_v25 = vmul.f32 %v1130_v26, %v2573_v57 }
 0x23d   : > { %v1163_v32 = vmul.f32 %v1131_v13, %v2580_v41 }
 0x23e   : > { %1381 = vmatmul.mubr.bf16.gmra.mrb[36].mxu0 %v1174_v10  ;;  %v1178_v11 = vpack.c.bf16 %v1162_v25, %v1160_v3 }
 0x23f   : > { %1388 = vmatprep.mubr.bf16.mxu0 %v1177_v22  ;;  %v1179_v5 = vpack.c.bf16 %v1163_v32, %v1161_v19 }
 0x246   : > { %1389 = vmatmul.mubr.bf16.gmra.mrb[40].mxu0 %v1176_v59 }
 0x247   : > { %1396 = vmatprep.mubr.bf16.mxu0 %v1179_v5 }
 0x24e   : > { %1397 = vmatmul.mubr.bf16.gmra.mrb[44].mxu0 %v1178_v11 }
 0x2e1   : > { %v1705_v54 = vpop.f32.mrb[16].mxu0 }
 0x2e2   : > { %v1706_v12 = vpop.f32.mrb[17].mxu0 }
 0x2e3   : > { %v1707_v57 = vadd.f32 %v1706_v12, %v1705_v54  ;;  %v1708_v29 = vpop.f32.mrb[18].mxu0  ;;  %v2706_v54 = vld [vmem:[#allocation3_spill] sm:$0xff] }
 0x2e4   : > { %v1709_v8 = vpop.f32.mrb[19].mxu0 }
 0x2e5   : > { %v1405_v41 = vadd.f32 %v1707_v57, %v2148_v63  ;;  %v1710_v4 = vadd.f32 %v1709_v8, %v1708_v29 }
 0x2e7   : > { %v1406_v21 = vadd.f32 %v1710_v4, %v2150_v0  ;;  %v1428_v40 = vadd.f32 %v2630_v50, %v1405_v41 }
 0x2e9   : > { %v1429_v49 = vadd.f32 %v2630_v50, %v1406_v21 }
 0x2eb   : > { %v1445_v46 = vpack.c.bf16 %v1429_v49, %v1428_v40 }
 0x2ec   : > { %v1711_v39 = vpop.f32.mrb[20].mxu0 }
 0x2ed   : > { %1763 = vmatpush3.bf16.msra.mxu1 %v1445_v46  ;;  %v1712_v62 = vpop.f32.mrb[21].mxu0 }
 0x2ee   : > { %1764 = vmatprep.subr.bf16.mxu1 %v1962_v6  ;;  %v1713_v27 = vadd.f32 %v1712_v62, %v1711_v39  ;;  %v1714_v63 = vpop.f32.mrb[22].mxu0  ;;  %v2708_v62 = vld [vmem:[#allocation5_spill] sm:$0xff] }
 0x2ef   : > { %v1715_v58 = vpop.f32.mrb[23].mxu0 }
 0x2f0   : > { %v1407_v7 = vadd.f32 %v1713_v27, %v2161_v16  ;;  %v1716_v35 = vadd.f32 %v1715_v58, %v1714_v63  ;;  %v2709_v58 = vld [vmem:[#allocation6_spill] sm:$0xff] }
 0x2f2   : > { %v1408_v23 = vadd.f32 %v1716_v35, %v2163_v17  ;;  %v1430_v0 = vadd.f32 %v2630_v50, %v1407_v7 }
 0x2f4   : > { %v1431_v15 = vadd.f32 %v2630_v50, %v1408_v23 }
 0x2f6   : > { %v1446_v24 = vpack.c.bf16 %v1431_v15, %v1430_v0  ;;  %v1717_v38 = vpop.f32.mrb[24].mxu0 }
 0x2f7   : > { %v1718_v30 = vpop.f32.mrb[25].mxu0 }
 0x2f8   : > { %v1719_v43 = vadd.f32 %v1718_v30, %v1717_v38  ;;  %v1720_v48 = vpop.f32.mrb[26].mxu0  ;;  %1765 = vmatpush3.bf16.msra.mxu1 %v1446_v24 }
 0x2f9   : > { %v1721_v14 = vpop.f32.mrb[27].mxu0  ;;  %1766 = vmatprep.subr.bf16.mxu1 %v1962_v6 }
 0x2fa   : > { %v1409_v60 = vadd.f32 %v1719_v43, %v2174_v33  ;;  %v1722_v2 = vadd.f32 %v1721_v14, %v1720_v48  ;;  %v2710_v48 = vld [vmem:[#allocation7_spill] sm:$0xff] }
 0x2fc   : > { %v1410_v16 = vadd.f32 %v1722_v2, %v2176_v34  ;;  %v1432_v17 = vadd.f32 %v2630_v50, %v1409_v60  ;;  %v2711_v2 = vld [vmem:[#allocation8_spill] sm:$0xff] }
 0x2fe   : > { %v1433_v45 = vadd.f32 %v2630_v50, %v1410_v16 }
 0x300   : > { %v1447_v10 = vpack.c.bf16 %v1433_v45, %v1432_v17 }
 0x301   : > { %v1723_v55 = vpop.f32.mrb[28].mxu0 }
 0x302   : > { %v1724_v36 = vpop.f32.mrb[29].mxu0  ;;  %1767 = vmatpush3.bf16.msra.mxu1 %v1447_v10 }
 0x303   : > { %v1725_v9 = vadd.f32 %v1724_v36, %v1723_v55  ;;  %v1726_v28 = vpop.f32.mrb[30].mxu0  ;;  %1768 = vmatprep.subr.bf16.mxu1 %v1962_v6  ;;  %v1444_v55 = vld [vmem:[%s2683_s2] sm:$0xf] }
 0x304   : > { %v1727_v44 = vpop.f32.mrb[31].mxu0 }
 0x305   : > { %v1411_v18 = vadd.f32 %v1725_v9, %v2187_v51  ;;  %v1728_v22 = vadd.f32 %v1727_v44, %v1726_v28  ;;  %v2705_v51 = vld [vmem:[#allocation2_spill] sm:$0xff] }
 0x307   : > { %v1412_v33 = vadd.f32 %v1728_v22, %v2189_v52  ;;  %v1434_v34 = vadd.f32 %v2630_v50, %v1411_v18 }
 0x309   : > { %v1435_v20 = vadd.f32 %v2630_v50, %v1412_v33  ;;  %v1729_v53 = vpop.f32.mrb[32].mxu0 }
 0x30a   : > { %v1730_v61 = vpop.f32.mrb[33].mxu0 }
 0x30b   : > { %v1448_v1 = vpack.c.bf16 %v1435_v20, %v1434_v34  ;;  %v1731_v37 = vadd.f32 %v1730_v61, %v1729_v53  ;;  %v1732_v47 = vpop.f32.mrb[34].mxu0 }
 0x30c   : > { %v1733_v31 = vpop.f32.mrb[35].mxu0 }
 0x30d   : > { %v1413_v42 = vadd.f32 %v1731_v37, %v2201_v56  ;;  %v1734_v59 = vadd.f32 %v1733_v31, %v1732_v47  ;;  %1769 = vmatpush3.bf16.msra.mxu1 %v1448_v1  ;;  %v2707_v56 = vld [vmem:[#allocation4_spill] sm:$0xff] }
 0x30e   : > { %1770 = vmatprep.subr.bf16.mxu1 %v1962_v6 }
 0x30f   : > { %v1414_v26 = vadd.f32 %v1734_v59, %v2705_v51  ;;  %v1436_v52 = vadd.f32 %v2630_v50, %v1413_v42 }
 0x311   : > { %v1437_v13 = vadd.f32 %v2630_v50, %v1414_v26  ;;  %v1735_v3 = vpop.f32.mrb[36].mxu0 }
 0x312   : > { %v1736_v25 = vpop.f32.mrb[37].mxu0 }
 0x313   : > { %v1449_v19 = vpack.c.bf16 %v1437_v13, %v1436_v52  ;;  %v1737_v32 = vadd.f32 %v1736_v25, %v1735_v3  ;;  %v1738_v11 = vpop.f32.mrb[38].mxu0 }
 0x314   : > { %v1739_v5 = vpop.f32.mrb[39].mxu0 }
 0x315   : > { %v1415_v12 = vadd.f32 %v1737_v32, %v2706_v54  ;;  %v1740_v57 = vadd.f32 %v1739_v5, %v1738_v11  ;;  %1771 = vmatpush3.bf16.msra.mxu1 %v1449_v19 }
 0x316   : > { %1772 = vmatprep.subr.bf16.mxu1 %v1962_v6 }
 0x317   : > { %v1416_v29 = vadd.f32 %v1740_v57, %v2707_v56  ;;  %v1438_v8 = vadd.f32 %v2630_v50, %v1415_v12 }
 0x319   : > { %v1439_v41 = vadd.f32 %v2630_v50, %v1416_v29  ;;  %v1741_v4 = vpop.f32.mrb[40].mxu0 }
 0x31a   : > { %v1742_v21 = vpop.f32.mrb[41].mxu0 }
 0x31b   : > { %v1450_v40 = vpack.c.bf16 %v1439_v41, %v1438_v8  ;;  %v1743_v49 = vadd.f32 %v1742_v21, %v1741_v4  ;;  %v1744_v46 = vpop.f32.mrb[42].mxu0 }
 0x31c   : > { %v1745_v39 = vpop.f32.mrb[43].mxu0 }
 0x31d   : > { %v1417_v27 = vadd.f32 %v1743_v49, %v2708_v62  ;;  %v1746_v63 = vadd.f32 %v1745_v39, %v1744_v46  ;;  %1773 = vmatpush3.bf16.msra.mxu1 %v1450_v40 }
 0x31e   : > { %1774 = vmatprep.subr.bf16.mxu1 %v1962_v6 }
 0x31f   : > { %v1418_v7 = vadd.f32 %v1746_v63, %v2709_v58  ;;  %v1440_v35 = vadd.f32 %v2630_v50, %v1417_v27 }
 0x321   : > { %v1441_v23 = vadd.f32 %v2630_v50, %v1418_v7  ;;  %v1747_v0 = vpop.f32.mrb[44].mxu0 }
 0x322   : > { %v1748_v15 = vpop.f32.mrb[45].mxu0 }
 0x323   : > { %v1451_v24 = vpack.c.bf16 %v1441_v23, %v1440_v35  ;;  %v1749_v38 = vadd.f32 %v1748_v15, %v1747_v0  ;;  %v1750_v30 = vpop.f32.mrb[46].mxu0 }
 0x324   : > { %v1751_v43 = vpop.f32.mrb[47].mxu0 }
 0x325   : > { %v1419_v14 = vadd.f32 %v1749_v38, %v2710_v48  ;;  %v1752_v60 = vadd.f32 %v1751_v43, %v1750_v30  ;;  %1775 = vmatpush3.bf16.msra.mxu1 %v1451_v24 }
 0x326   : > { %1776 = vmatprep.subr.bf16.mxu1 %v1962_v6 }
 0x327   : > { %v1420_v16 = vadd.f32 %v1752_v60, %v2711_v2  ;;  %v1442_v17 = vadd.f32 %v2630_v50, %v1419_v14 }
 0x329   : > { %v1443_v45 = vadd.f32 %v2630_v50, %v1420_v16 }
 0x32b   : > { %v1452_v10 = vpack.c.bf16 %v1443_v45, %v1442_v17 }
 0x32d   : > { %1777 = vmatpush3.bf16.msra.mxu1 %v1452_v10 }
 0x330   : > { %1779 = vmatmul.mubr.bf16.vlgmr.msra.gmra.mrb[48].mxu1 %v1444_v55 }
 0x403   : > { %v1487_v6 = vpop.f32.mrb[48].mxu1 }
 0x404   : > { %v1493_v36 = vpack.c.bf16 %v1487_v6, %v1487_v6  ;;  %v1780_v9 = vpop.f32.mrb[49].mxu1 }
 0x405   : > { %v1490_v28 = vpop.f32.mrb[50].mxu1 }
 0x406   : > { %1494 = vst [vmem:[%s308_s12] sm:$0xf] %v1493_v36  ;;  %v1781_v50 = vpop.f32.mrb[51].mxu1 }
 0x407 PF: > { %s18_s27 = sadd.s32 1, %s1959_s27  }
 0x408   : > { %p15_p5 = scmp.ge.s32.totalorder %s18_s27, 4  }
 0x40a   :  { %17 = sbr.rel (!%p15_p5) target bundleno = 1 (0x1), region = 82 }

// kernel: _lambda_.4
= control target key start
LH: loop header
LB: loop body
LE: loop exit
PB: predicated region body
PF: predicated region fallthrough
CT: control target
= control target key end

     0   :  { %v292_v1 = vmov 0.0   ;;  %vm293_vm0 = vmmov 0   ;;  %vm28_vm1 = vcmask 130048   ;;  %s365_s0 = inlined_call_operand.vmem [shape: bf16[4,16], index: 0, kind: input, shape index: {}]   ;;  %s366_s1 = inlined_call_operand.vmem [shape: bf16[16,128], index: 1, kind: input, shape index: {}]   ;;  %s367_s2 = inlined_call_operand.vmem [shape: bf16[128,128], index: 2, kind: input, shape index: {}]   ;;  %s368_s3 = inlined_call_operand.vmem [shape: f32[1,128], index: 3, kind: input, shape index: {}]   ;;  %s369_s4 = inlined_call_operand.hbm [shape: f32[4,128], index: 4, kind: output, shape index: {}]  }
   0x1   :  { %v257_v0 = vld [vmem:[%s366_s1] sm:$0xff]   ;;  %228 = vmatprep.subr.bf16.mxu0 %v292_v1  ;;  %234 = vmatprep.subr.bf16.mxu1 %v292_v1  ;;  %v259_v4 = vld [vmem:[%s367_s2 + $0x8] sm:$0xff]   ;;  %v260_v5 = vld [vmem:[%s367_s2 + $0x10] sm:$0xff]  }
   0x2   :  { %v19_v2 = vld [vmem:[%s365_s0] sm:$0x3]  ;;  %229 = vmatpush3.bf16.msra.mxu0 %v257_v0  ;;  %230 = vmatprep.mubr.msk.bf16.mxu0 %vm293_vm0, %v292_v1 }
   0x3   :  { %v258_v3 = vld [vmem:[%s367_s2] sm:$0xff]   ;;  %250 = vmatprep.mubr.msk.bf16.mxu1 %vm293_vm0, %v292_v1 }
   0x4   :  { %235 = vmatpush3.bf16.msra.mxu1 %v258_v3 }
   0x5   :  { %231 = vmatmul.mubr.msk.bf16.vlgmr.msra.gmra.mrb[0].mxu0 %vm28_vm1, %v19_v2  ;;  %236 = vmatprep.subr.bf16.mxu1 %v292_v1 }
   0x8   :  { %237 = vmatpush3.bf16.msra.mxu1 %v259_v4 }
   0x9   :  { %238 = vmatprep.subr.bf16.mxu1 %v292_v1 }
   0xa   :  { %9 = vsyncpa [#allocation3], 0  ;;  %v261_v6 = vld [vmem:[%s367_s2 + $0x18] sm:$0xff]   ;;  %v262_v7 = vld [vmem:[%s367_s2 + $0x20] sm:$0xff]   ;;  %vm185_vm2 = vcmask 1043456  }
   0xb   :  { %v263_v8 = vld [vmem:[%s367_s2 + $0x28] sm:$0xff]   ;;  %v264_v9 = vld [vmem:[%s367_s2 + $0x30] sm:$0xff]   ;;  %v265_v10 = vld [vmem:[%s367_s2 + $0x38] sm:$0xff]   ;;  %s294_s2 = smov [#allocation2]  }
   0xc   :  { %239 = vmatpush3.bf16.msra.mxu1 %v260_v5  ;;  %v208_v16 = vld [vmem:[%s368_s3] ss:$0 sm:$0xff]  ;;  %s198_s9 = sshll.u32 %s294_s2, 4  ;;  %s199_s9 = int_to_ptr.vmem [resolvable:$true] %s198_s9 }
   0xd   :  { %240 = vmatprep.subr.bf16.mxu1 %v292_v1  ;;  %s268_s10 = scalar_lea.vmem %s199_s9, 64  ;;  %p273_p1 = scmp.lt.s32.totalorder %s199_s9, %s199_s9 }
   0xe   :  { %p269_p0 = scmp.ne.s32.totalorder %s199_s9, %s268_s10  ;;  %p274_p2 = scmp.lt.s32.totalorder %s268_s10, %s268_s10 }
  0x10   :  { %241 = vmatpush3.bf16.msra.mxu1 %v261_v6  ;;  %p275_p3 = por %p274_p2, %p273_p1 }
  0x11   :  { %242 = vmatprep.subr.bf16.mxu1 %v292_v1 }
  0x12   :  { %p276_p4 = pnand %p275_p3, %p269_p0 }
  0x14   :  { %243 = vmatpush3.bf16.msra.mxu1 %v262_v7 }
  0x15   :  { %244 = vmatprep.subr.bf16.mxu1 %v292_v1 }
  0x18   :  { %245 = vmatpush3.bf16.msra.mxu1 %v263_v8 }
  0x19   :  { %246 = vmatprep.subr.bf16.mxu1 %v292_v1 }
  0x1c   :  { %247 = vmatpush3.bf16.msra.mxu1 %v264_v9 }
  0x1d   :  { %248 = vmatprep.subr.bf16.mxu1 %v292_v1 }
  0x20   :  { %249 = vmatpush3.bf16.msra.mxu1 %v265_v10 }
  0xd8   :  { %v66_v11 = vpop.f32.mrb[0].mxu0 }
  0xd9   :  { %v72_v12 = vpack.c.bf16 %v66_v11, %v66_v11  ;;  %v232_v13 = vpop.f32.mrb[1].mxu0 }
  0xda   :  { %v69_v14 = vpop.f32.mrb[2].mxu0 }
  0xdb   :  { %v233_v15 = vpop.f32.mrb[3].mxu0  ;;  %251 = vmatmul.mubr.bf16.vlgmr.msra.gmra.mrb[0].mxu1 %v72_v12 }
 0x1ae   :  { %v178_v17 = vpop.f32.mrb[0].mxu1 }
 0x1af   :  { %v179_v18 = vadd.f32 %v208_v16, %v178_v17  ;;  %v252_v19 = vpop.f32.mrb[1].mxu1 }
 0x1b0   :  { %v181_v20 = vpop.f32.mrb[2].mxu1 }
 0x1b1   :  { %v253_v21 = vpop.f32.mrb[3].mxu1  ;;  %v184_v22 = vmul.f32 %v179_v18, %v179_v18 }
 0x1b3   :  { %v186_v23 = vsel %vm185_vm2, %v184_v22, 0.0 }
 0x1b4   :  { %187 = vadd.xlane.f32.xlu0 %v186_v23 }
 0x241   :  { %v188_v24 = vpop.xlane.xlu0 %187 }
 0x242   :  { %266 = vrsqrt.f32 %v188_v24 }
 0x24c   :  { %v267_v25 = vpop.eup %266 }
 0x24d   :  { %v190_v26 = vmul.f32 %v267_v25, %v179_v18 }
 0x24f   :  { %191 = vst [vmem:[#allocation2] sm:$0xf] %v190_v26 }
 0x250   :  { %279 = shalt.err (!%p276_p4)
}
 0x251   :  { %s280_s12 = scalar_lea.hbm %s369_s4, 64 }
 0x252   :  { %p281_p5 = scmp.ne.s32.totalorder %s369_s4, %s280_s12  ;;  %p284_p6 = scmp.lt.u32.totalorder %s280_s12, %s369_s4 }
 0x254   :  { %p286_p7 = pnand %p284_p6, %p281_p5 }
 0x256   :  { %289 = shalt.err (!%p286_p7)
}
 0x257   :  { %201 = dma.vmem_to_hbm [thread:$0]  %s199_s9, 64, %s369_s4, [#allocation3]  }
 0x258   :  { %290 = dma.done.wait [#allocation3], 64  }
 0x259   :  { %291 = vsyncadd [#allocation3], 4294967232 }
 0x25a   :  { %205 = vsyncpa [#allocation3], 1 }

// kernel: _lambda_.5
= control target key start
LH: loop header
LB: loop body
LE: loop exit
PB: predicated region body
PF: predicated region fallthrough
CT: control target
= control target key end

     0   :  { %v225_v1 = vmov 0.0   ;;  %vm226_vm0 = vmmov 0   ;;  %s290_s0 = inlined_call_operand.vmem [shape: bf16[4,128], index: 0, kind: input, shape index: {}]   ;;  %s291_s1 = inlined_call_operand.vmem [shape: bf16[128,128], index: 1, kind: input, shape index: {}]   ;;  %s292_s2 = inlined_call_operand.vmem [shape: f32[1,128], index: 2, kind: input, shape index: {}]   ;;  %s293_s3 = inlined_call_operand.hbm [shape: f32[4,128], index: 3, kind: output, shape index: {}]  }
   0x1   :  { %v191_v0 = vld [vmem:[%s291_s1] sm:$0xff]   ;;  %168 = vmatprep.subr.bf16.mxu0 %v225_v1  ;;  %v192_v2 = vld [vmem:[%s291_s1 + $0x8] sm:$0xff]   ;;  %184 = vmatprep.mubr.msk.bf16.mxu0 %vm226_vm0, %v225_v1  ;;  %v193_v3 = vld [vmem:[%s291_s1 + $0x10] sm:$0xff]  }
   0x2   :  { %169 = vmatpush3.bf16.msra.mxu0 %v191_v0 }
   0x3   :  { %170 = vmatprep.subr.bf16.mxu0 %v225_v1 }
   0x6   :  { %171 = vmatpush3.bf16.msra.mxu0 %v192_v2 }
   0x7   :  { %172 = vmatprep.subr.bf16.mxu0 %v225_v1 }
   0x8   :  { %8 = vsyncpa [#allocation3], 0  ;;  %v194_v4 = vld [vmem:[%s291_s1 + $0x18] sm:$0xff]   ;;  %v195_v5 = vld [vmem:[%s291_s1 + $0x20] sm:$0xff]   ;;  %vm129_vm1 = vcmask 1043456  }
   0x9   :  { %v196_v6 = vld [vmem:[%s291_s1 + $0x28] sm:$0xff]   ;;  %v197_v7 = vld [vmem:[%s291_s1 + $0x30] sm:$0xff]   ;;  %v198_v8 = vld [vmem:[%s291_s1 + $0x38] sm:$0xff]   ;;  %s227_s1 = smov [#allocation2]  }
   0xa   :  { %173 = vmatpush3.bf16.msra.mxu0 %v193_v3  ;;  %v16_v9 = vld [vmem:[%s290_s0] sm:$0x3]  ;;  %s142_s5 = sshll.u32 %s227_s1, 4  ;;  %s143_s5 = int_to_ptr.vmem [resolvable:$true] %s142_s5 }
   0xb   :  { %174 = vmatprep.subr.bf16.mxu0 %v225_v1  ;;  %v150_v10 = vld [vmem:[%s292_s2] ss:$0 sm:$0xff]  ;;  %s201_s0 = scalar_lea.vmem %s143_s5, 64  ;;  %p206_p1 = scmp.lt.s32.totalorder %s143_s5, %s143_s5 }
   0xc   :  { %p202_p0 = scmp.ne.s32.totalorder %s143_s5, %s201_s0  ;;  %p207_p2 = scmp.lt.s32.totalorder %s201_s0, %s201_s0 }
   0xe   :  { %175 = vmatpush3.bf16.msra.mxu0 %v194_v4  ;;  %p208_p3 = por %p207_p2, %p206_p1 }
   0xf   :  { %176 = vmatprep.subr.bf16.mxu0 %v225_v1 }
  0x10   :  { %p209_p4 = pnand %p208_p3, %p202_p0 }
  0x12   :  { %177 = vmatpush3.bf16.msra.mxu0 %v195_v5 }
  0x13   :  { %178 = vmatprep.subr.bf16.mxu0 %v225_v1 }
  0x16   :  { %179 = vmatpush3.bf16.msra.mxu0 %v196_v6 }
  0x17   :  { %180 = vmatprep.subr.bf16.mxu0 %v225_v1 }
  0x1a   :  { %181 = vmatpush3.bf16.msra.mxu0 %v197_v7 }
  0x1b   :  { %182 = vmatprep.subr.bf16.mxu0 %v225_v1 }
  0x1e   :  { %183 = vmatpush3.bf16.msra.mxu0 %v198_v8 }
  0x21   :  { %185 = vmatmul.mubr.bf16.vlgmr.msra.gmra.mrb[0].mxu0 %v16_v9 }
  0xf4   :  { %v122_v11 = vpop.f32.mrb[0].mxu0 }
  0xf5   :  { %v123_v12 = vadd.f32 %v150_v10, %v122_v11  ;;  %v186_v13 = vpop.f32.mrb[1].mxu0 }
  0xf6   :  { %v125_v14 = vpop.f32.mrb[2].mxu0 }
  0xf7   :  { %v187_v15 = vpop.f32.mrb[3].mxu0  ;;  %v128_v16 = vmul.f32 %v123_v12, %v123_v12 }
  0xf9   :  { %v130_v17 = vsel %vm129_vm1, %v128_v16, 0.0 }
  0xfa   :  { %131 = vadd.xlane.f32.xlu0 %v130_v17 }
 0x187   :  { %v132_v18 = vpop.xlane.xlu0 %131 }
 0x188   :  { %199 = vrsqrt.f32 %v132_v18 }
 0x192   :  { %v200_v19 = vpop.eup %199 }
 0x193   :  { %v134_v20 = vmul.f32 %v200_v19, %v123_v12 }
 0x195   :  { %135 = vst [vmem:[#allocation2] sm:$0xf] %v134_v20 }
 0x196   :  { %212 = shalt.err (!%p209_p4)
}
 0x197   :  { %s213_s7 = scalar_lea.hbm %s293_s3, 64 }
 0x198   :  { %p214_p5 = scmp.ne.s32.totalorder %s293_s3, %s213_s7  ;;  %p217_p6 = scmp.lt.u32.totalorder %s213_s7, %s293_s3 }
 0x19a   :  { %p219_p7 = pnand %p217_p6, %p214_p5 }
 0x19c   :  { %222 = shalt.err (!%p219_p7)
}
 0x19d   :  { %145 = dma.vmem_to_hbm [thread:$0]  %s143_s5, 64, %s293_s3, [#allocation3]  }
 0x19e   :  { %223 = dma.done.wait [#allocation3], 64  }
 0x19f   :  { %224 = vsyncadd [#allocation3], 4294967232 }
 0x1a0   :  { %149 = vsyncpa [#allocation3], 1 }

</bundles_post_ra>
